<compile_context>
chip_gen: v7x
topology: tpu7x:2x2x1
jax: 0.10.0
libtpu: 0.0.40
codegen_flags: <defaults>
</compile_context>

<pallas_src>
import jax
import jax.numpy as jnp
from jax.experimental import pallas as pl
from jax.experimental.pallas import tpu as pltpu

D_MODEL = 32
D_FF = 64
N_LAYERS = 2
EPS = 1e-6

# Ordering of the stacked per-layer parameters handed to the kernel.
_LAYER_PARAM_NAMES = (
    "ln1_g", "ln1_b", "wqkv1", "bqkv1", "wo1", "bo1",
    "ln2_g", "ln2_b", "wq2", "bq2", "wkv2", "bkv2", "wo2", "bo2",
    "ln3_g", "ln3_b", "wf1", "bf1", "wf2", "bf2",
)


# ------------------------------ fused kernel --------------------------------

def _decoder_kernel(x_ref, mem_ref, pmask_ref, lmask_ref, *rest):
    *layer_refs, fg_ref, fb_ref, o_ref = rest
    p = dict(zip(_LAYER_PARAM_NAMES, layer_refs))

    x = x_ref[0]          # (Sq, D)
    mem = mem_ref[0]      # (Smem, D)
    pmask = pmask_ref[0]  # (1, Smem)  (broadcast along query rows in-kernel)
    lmask = lmask_ref[0]  # (Sq, Sq)
    d = x.shape[-1]

    def ln(v, g, b):
        # Annotated-transformer LayerNorm: g*(v-mean)/(std+eps)+b, unbiased std.
        n = v.shape[-1]
        mean = jnp.sum(v, axis=-1, keepdims=True) * (1.0 / n)
        vc = v - mean
        var = jnp.sum(vc * vc, axis=-1, keepdims=True) * (1.0 / (n - 1))
        inv = pl.reciprocal(jnp.sqrt(var) + EPS, approx=False)
        return vc * inv * g + b

    def attend(q, k, v, mask):
        scale = 1.0 / jnp.sqrt(jnp.float32(q.shape[-1]))
        s = jax.lax.dot_general(
            q, k, (((1,), (1,)), ((), ())),
            preferred_element_type=jnp.float32) * scale
        s = jnp.where(mask == 0.0, jnp.float32(-1e9), s)
        e = jnp.exp(s - jnp.max(s, axis=-1, keepdims=True))
        inv = pl.reciprocal(jnp.sum(e, axis=-1, keepdims=True), approx=True)
        return jnp.dot(e * inv, v, preferred_element_type=jnp.float32)

    for li in range(N_LAYERS):  # static unroll; identical-init (deepcopy) layers
        # --- masked self-attention (pre-norm residual), fused QKV matmul ---
        xn = ln(x, p["ln1_g"][li], p["ln1_b"][li])
        qkv = (jnp.dot(xn, p["wqkv1"][li], preferred_element_type=jnp.float32)
               + p["bqkv1"][li])
        q, k, v = qkv[:, :d], qkv[:, d:2 * d], qkv[:, 2 * d:]
        a = attend(q, k, v, lmask)
        x = x + (jnp.dot(a, p["wo1"][li], preferred_element_type=jnp.float32)
                 + p["bo1"][li])

        # --- cross-attention over memory (pre-norm residual), fused KV matmul ---
        xn = ln(x, p["ln2_g"][li], p["ln2_b"][li])
        q = (jnp.dot(xn, p["wq2"][li], preferred_element_type=jnp.float32)
             + p["bq2"][li])
        kv = (jnp.dot(mem, p["wkv2"][li], preferred_element_type=jnp.float32)
              + p["bkv2"][li])
        k, v = kv[:, :d], kv[:, d:]
        a = attend(q, k, v, pmask)
        x = x + (jnp.dot(a, p["wo2"][li], preferred_element_type=jnp.float32)
                 + p["bo2"][li])

        # --- position-wise feed-forward (pre-norm residual) ---
        xn = ln(x, p["ln3_g"][li], p["ln3_b"][li])
        h = jnp.maximum(
            jnp.dot(xn, p["wf1"][li], preferred_element_type=jnp.float32)
            + p["bf1"][li], 0.0)
        x = x + (jnp.dot(h, p["wf2"][li], preferred_element_type=jnp.float32)
                 + p["bf2"][li])

    o_ref[0] = ln(x, fg_ref[...], fb_ref[...])


# ------------------------------- wrapper -------------------------------------

def decoder_forward(x, memory, price_series_mask, local_price_mask,
                    padding_price, params):
    del padding_price  # TODO(synk): unused — DecoderLayer body not provided.
    B, Sq, D = x.shape
    Smem = memory.shape[1]

    pmask = jnp.broadcast_to(price_series_mask, (B, 1, Smem)).astype(jnp.float32)
    lmask = jnp.broadcast_to(local_price_mask, (B, Sq, Sq)).astype(jnp.float32)

    in_specs = [
        pl.BlockSpec((1, Sq, D), lambda b: (b, 0, 0)),     # x
        pl.BlockSpec((1, Smem, D), lambda b: (b, 0, 0)),   # memory
        pl.BlockSpec((1, 1, Smem), lambda b: (b, 0, 0)),   # price_series_mask row
        pl.BlockSpec((1, Sq, Sq), lambda b: (b, 0, 0)),    # local_price_mask
    ]
    args = [x, memory, pmask, lmask]

    # Stacked per-layer params: full-array blocks, same block every grid step
    # (Pallas skips the redundant re-DMA), so they stay VMEM-resident.
    for name in _LAYER_PARAM_NAMES:
        arr = params[name]
        in_specs.append(
            pl.BlockSpec(arr.shape, lambda b, _nd=arr.ndim: (0,) * _nd))
        args.append(arr)
    for arr in (params["final_g"], params["final_b"]):
        in_specs.append(pl.BlockSpec(arr.shape, lambda b: (0, 0)))
        args.append(arr)

    return pl.pallas_call(
        _decoder_kernel,
        out_shape=jax.ShapeDtypeStruct((B, Sq, D), jnp.float32),
        grid=(B,),
        in_specs=in_specs,
        out_specs=pl.BlockSpec((1, Sq, D), lambda b: (b, 0, 0)),
        compiler_params=pltpu.CompilerParams(
            dimension_semantics=("parallel",)),  # B maps onto v7x's 2 TCs
    )(*args)


# ------------------------------ param init -----------------------------------

def init_params(key):
    def dense(k, din, dout):
        w = jax.random.normal(k, (din, dout), jnp.float32) * 0.1
        b = jnp.zeros((1, dout), jnp.float32)
        return w, b

    keys = jax.random.split(key, 10)
    wq1, bq1 = dense(keys[0], D_MODEL, D_MODEL)
    wk1, bk1 = dense(keys[1], D_MODEL, D_MODEL)
    wv1, bv1 = dense(keys[2], D_MODEL, D_MODEL)
    wo1, bo1 = dense(keys[3], D_MODEL, D_MODEL)
    wq2, bq2 = dense(keys[4], D_MODEL, D_MODEL)
    wk2, bk2 = dense(keys[5], D_MODEL, D_MODEL)
    wv2, bv2 = dense(keys[6], D_MODEL, D_MODEL)
    wo2, bo2 = dense(keys[7], D_MODEL, D_MODEL)
    wf1, bf1 = dense(keys[8], D_MODEL, D_FF)
    wf2, bf2 = dense(keys[9], D_FF, D_MODEL)

    ones = jnp.ones((1, D_MODEL), jnp.float32)
    zeros = jnp.zeros((1, D_MODEL), jnp.float32)
    one_layer = {
        "ln1_g": ones, "ln1_b": zeros,
        "wqkv1": jnp.concatenate([wq1, wk1, wv1], axis=1),   # (D, 3D)
        "bqkv1": jnp.concatenate([bq1, bk1, bv1], axis=1),   # (1, 3D)
        "wo1": wo1, "bo1": bo1,
        "ln2_g": ones, "ln2_b": zeros,
        "wq2": wq2, "bq2": bq2,
        "wkv2": jnp.concatenate([wk2, wv2], axis=1),         # (D, 2D)
        "bkv2": jnp.concatenate([bk2, bv2], axis=1),         # (1, 2D)
        "wo2": wo2, "bo2": bo2,
        "ln3_g": ones, "ln3_b": zeros,
        "wf1": wf1, "bf1": jnp.zeros((1, D_FF), jnp.float32),
        "wf2": wf2, "bf2": bf2,
    }
    # copy.deepcopy(layer) x N  ->  N identical stacked parameter sets.
    params = {name: jnp.stack([one_layer[name]] * N_LAYERS, axis=0)
              for name in _LAYER_PARAM_NAMES}
    params["final_g"] = jnp.ones((1, D_MODEL), jnp.float32)
    params["final_b"] = jnp.zeros((1, D_MODEL), jnp.float32)
    return params


# ---------------------------------- main --------------------------------------

if __name__ == "__main__":
    B, S_TGT, S_MEM = 2, 8, 8
    key = jax.random.PRNGKey(0)
    k1, k2, k3 = jax.random.split(key, 3)

    x = jax.random.normal(k1, (B, S_TGT, D_MODEL), jnp.float32)
    memory = jax.random.normal(k2, (B, S_MEM, D_MODEL), jnp.float32)

    # price_series_mask: (B, 1, S_MEM) — 1 = keep, 0 = padded memory position.
    price_series_mask = jnp.ones((B, 1, S_MEM), jnp.float32).at[:, :, -1].set(0.0)
    # local_price_mask: (B, S_TGT, S_TGT) — causal (subsequent) mask.
    local_price_mask = jnp.broadcast_to(
        jnp.tril(jnp.ones((S_TGT, S_TGT), jnp.float32)), (B, S_TGT, S_TGT))
    # padding_price: unused placeholder (see TODO above).
    padding_price = jnp.zeros((B, 1, D_MODEL), jnp.float32)

    params = init_params(k3)

    fwd = jax.jit(decoder_forward)
    out = fwd(x, memory, price_series_mask, local_price_mask, padding_price,
              params)
    jax.block_until_ready(out)

    assert out.shape == (B, S_TGT, D_MODEL)
    assert jnp.all(jnp.isfinite(out))
    print("KERNEL_OK")
</pallas_src>

<mosaic_0001>
module attributes {stable_mosaic.version = 11 : i64} {
  func.func @_decoder_kernel(%arg0: i32, %arg1: memref<1x8x32xf32, #tpu.memory_space<vmem>>, %arg2: memref<1x8x32xf32, #tpu.memory_space<vmem>>, %arg3: memref<1x1x8xf32, #tpu.memory_space<vmem>>, %arg4: memref<1x8x8xf32, #tpu.memory_space<vmem>>, %arg5: memref<2x1x32xf32, #tpu.memory_space<vmem>>, %arg6: memref<2x1x32xf32, #tpu.memory_space<vmem>>, %arg7: memref<2x32x96xf32, #tpu.memory_space<vmem>>, %arg8: memref<2x1x96xf32, #tpu.memory_space<vmem>>, %arg9: memref<2x32x32xf32, #tpu.memory_space<vmem>>, %arg10: memref<2x1x32xf32, #tpu.memory_space<vmem>>, %arg11: memref<2x1x32xf32, #tpu.memory_space<vmem>>, %arg12: memref<2x1x32xf32, #tpu.memory_space<vmem>>, %arg13: memref<2x32x32xf32, #tpu.memory_space<vmem>>, %arg14: memref<2x1x32xf32, #tpu.memory_space<vmem>>, %arg15: memref<2x32x64xf32, #tpu.memory_space<vmem>>, %arg16: memref<2x1x64xf32, #tpu.memory_space<vmem>>, %arg17: memref<2x32x32xf32, #tpu.memory_space<vmem>>, %arg18: memref<2x1x32xf32, #tpu.memory_space<vmem>>, %arg19: memref<2x1x32xf32, #tpu.memory_space<vmem>>, %arg20: memref<2x1x32xf32, #tpu.memory_space<vmem>>, %arg21: memref<2x32x64xf32, #tpu.memory_space<vmem>>, %arg22: memref<2x1x64xf32, #tpu.memory_space<vmem>>, %arg23: memref<2x64x32xf32, #tpu.memory_space<vmem>>, %arg24: memref<2x1x32xf32, #tpu.memory_space<vmem>>, %arg25: memref<1x32xf32, #tpu.memory_space<vmem>>, %arg26: memref<1x32xf32, #tpu.memory_space<vmem>>, %arg27: memref<1x8x32xf32, #tpu.memory_space<vmem>>) attributes {dimension_semantics = [#tpu.dimension_semantics<parallel>], iteration_bounds = array<i64: 2>, scalar_prefetch = 0 : i64, scratch_operands = 0 : i64, tpu.core_type = #tpu.core_type<tc>, window_params = [{transform_indices = @transform_0, window_bounds = array<i64: 1, 8, 32>}, {transform_indices = @transform_1, window_bounds = array<i64: 1, 8, 32>}, {transform_indices = @transform_2, window_bounds = array<i64: 1, 1, 8>}, {transform_indices = @transform_3, window_bounds = array<i64: 1, 8, 8>}, {pipeline_mode = #tpu.pipeline_mode<synchronous>, transform_indices = @transform_4, window_bounds = array<i64: 2, 1, 32>}, {pipeline_mode = #tpu.pipeline_mode<synchronous>, transform_indices = @transform_5, window_bounds = array<i64: 2, 1, 32>}, {pipeline_mode = #tpu.pipeline_mode<synchronous>, transform_indices = @transform_6, window_bounds = array<i64: 2, 32, 96>}, {pipeline_mode = #tpu.pipeline_mode<synchronous>, transform_indices = @transform_7, window_bounds = array<i64: 2, 1, 96>}, {pipeline_mode = #tpu.pipeline_mode<synchronous>, transform_indices = @transform_8, window_bounds = array<i64: 2, 32, 32>}, {pipeline_mode = #tpu.pipeline_mode<synchronous>, transform_indices = @transform_9, window_bounds = array<i64: 2, 1, 32>}, {pipeline_mode = #tpu.pipeline_mode<synchronous>, transform_indices = @transform_10, window_bounds = array<i64: 2, 1, 32>}, {pipeline_mode = #tpu.pipeline_mode<synchronous>, transform_indices = @transform_11, window_bounds = array<i64: 2, 1, 32>}, {pipeline_mode = #tpu.pipeline_mode<synchronous>, transform_indices = @transform_12, window_bounds = array<i64: 2, 32, 32>}, {pipeline_mode = #tpu.pipeline_mode<synchronous>, transform_indices = @transform_13, window_bounds = array<i64: 2, 1, 32>}, {pipeline_mode = #tpu.pipeline_mode<synchronous>, transform_indices = @transform_14, window_bounds = array<i64: 2, 32, 64>}, {pipeline_mode = #tpu.pipeline_mode<synchronous>, transform_indices = @transform_15, window_bounds = array<i64: 2, 1, 64>}, {pipeline_mode = #tpu.pipeline_mode<synchronous>, transform_indices = @transform_16, window_bounds = array<i64: 2, 32, 32>}, {pipeline_mode = #tpu.pipeline_mode<synchronous>, transform_indices = @transform_17, window_bounds = array<i64: 2, 1, 32>}, {pipeline_mode = #tpu.pipeline_mode<synchronous>, transform_indices = @transform_18, window_bounds = array<i64: 2, 1, 32>}, {pipeline_mode = #tpu.pipeline_mode<synchronous>, transform_indices = @transform_19, window_bounds = array<i64: 2, 1, 32>}, {pipeline_mode = #tpu.pipeline_mode<synchronous>, transform_indices = @transform_20, window_bounds = array<i64: 2, 32, 64>}, {pipeline_mode = #tpu.pipeline_mode<synchronous>, transform_indices = @transform_21, window_bounds = array<i64: 2, 1, 64>}, {pipeline_mode = #tpu.pipeline_mode<synchronous>, transform_indices = @transform_22, window_bounds = array<i64: 2, 64, 32>}, {pipeline_mode = #tpu.pipeline_mode<synchronous>, transform_indices = @transform_23, window_bounds = array<i64: 2, 1, 32>}, {pipeline_mode = #tpu.pipeline_mode<synchronous>, transform_indices = @transform_24, window_bounds = array<i64: 1, 32>}, {pipeline_mode = #tpu.pipeline_mode<synchronous>, transform_indices = @transform_25, window_bounds = array<i64: 1, 32>}, {transform_indices = @transform_26, window_bounds = array<i64: 1, 8, 32>}]} {
    %c0 = arith.constant 0 : index
    %c0_0 = arith.constant 0 : index
    %c0_1 = arith.constant 0 : index
    %0 = vector.load %arg1[%c0, %c0_0, %c0_1] : memref<1x8x32xf32, #tpu.memory_space<vmem>>, vector<1x8x32xf32>
    %1 = vector.shape_cast %0 : vector<1x8x32xf32> to vector<8x32xf32>
    %c0_2 = arith.constant 0 : index
    %c0_3 = arith.constant 0 : index
    %c0_4 = arith.constant 0 : index
    %2 = vector.load %arg2[%c0_2, %c0_3, %c0_4] : memref<1x8x32xf32, #tpu.memory_space<vmem>>, vector<1x8x32xf32>
    %3 = vector.shape_cast %2 : vector<1x8x32xf32> to vector<8x32xf32>
    %c0_5 = arith.constant 0 : index
    %c0_6 = arith.constant 0 : index
    %c0_7 = arith.constant 0 : index
    %4 = vector.load %arg3[%c0_5, %c0_6, %c0_7] : memref<1x1x8xf32, #tpu.memory_space<vmem>>, vector<1x1x8xf32>
    %5 = vector.shape_cast %4 : vector<1x1x8xf32> to vector<1x8xf32>
    %c0_8 = arith.constant 0 : index
    %c0_9 = arith.constant 0 : index
    %c0_10 = arith.constant 0 : index
    %6 = vector.load %arg4[%c0_8, %c0_9, %c0_10] : memref<1x8x8xf32, #tpu.memory_space<vmem>>, vector<1x8x8xf32>
    %7 = vector.shape_cast %6 : vector<1x8x8xf32> to vector<8x8xf32>
    %c0_11 = arith.constant 0 : index
    %c0_12 = arith.constant 0 : index
    %c0_13 = arith.constant 0 : index
    %8 = vector.load %arg5[%c0_11, %c0_12, %c0_13] : memref<2x1x32xf32, #tpu.memory_space<vmem>>, vector<1x1x32xf32>
    %9 = vector.shape_cast %8 : vector<1x1x32xf32> to vector<1x32xf32>
    %c0_14 = arith.constant 0 : index
    %c0_15 = arith.constant 0 : index
    %c0_16 = arith.constant 0 : index
    %10 = vector.load %arg6[%c0_14, %c0_15, %c0_16] : memref<2x1x32xf32, #tpu.memory_space<vmem>>, vector<1x1x32xf32>
    %11 = vector.shape_cast %10 : vector<1x1x32xf32> to vector<1x32xf32>
    %cst = arith.constant dense<0.000000e+00> : vector<8xf32>
    %12 = vector.multi_reduction <add>, %1, %cst [1] : vector<8x32xf32> to vector<8xf32>
    %13 = vector.shape_cast %12 : vector<8xf32> to vector<8x1xf32>
    %cst_17 = arith.constant 3.125000e-02 : f32
    %14 = vector.broadcast %cst_17 : f32 to vector<8x1xf32>
    %15 = arith.mulf %13, %14 : vector<8x1xf32>
    %16 = vector.broadcast %15 : vector<8x1xf32> to vector<8x32xf32>
    %17 = arith.subf %1, %16 : vector<8x32xf32>
    %18 = arith.mulf %17, %17 : vector<8x32xf32>
    %cst_18 = arith.constant dense<0.000000e+00> : vector<8xf32>
    %19 = vector.multi_reduction <add>, %18, %cst_18 [1] : vector<8x32xf32> to vector<8xf32>
    %20 = vector.shape_cast %19 : vector<8xf32> to vector<8x1xf32>
    %cst_19 = arith.constant 0.0322580636 : f32
    %21 = vector.broadcast %cst_19 : f32 to vector<8x1xf32>
    %22 = arith.mulf %20, %21 : vector<8x1xf32>
    %23 = math.sqrt %22 : vector<8x1xf32>
    %cst_20 = arith.constant 9.99999997E-7 : f32
    %24 = vector.broadcast %cst_20 : f32 to vector<8x1xf32>
    %25 = arith.addf %23, %24 : vector<8x1xf32>
    %26 = tpu.reciprocal %25 : vector<8x1xf32> -> vector<8x1xf32>
    %27 = vector.broadcast %26 : vector<8x1xf32> to vector<8x32xf32>
    %28 = arith.mulf %17, %27 : vector<8x32xf32>
    %29 = vector.broadcast %9 : vector<1x32xf32> to vector<8x32xf32>
    %30 = arith.mulf %28, %29 : vector<8x32xf32>
    %31 = vector.broadcast %11 : vector<1x32xf32> to vector<8x32xf32>
    %32 = arith.addf %30, %31 : vector<8x32xf32>
    %c0_21 = arith.constant 0 : index
    %c0_22 = arith.constant 0 : index
    %c0_23 = arith.constant 0 : index
    %33 = vector.load %arg7[%c0_21, %c0_22, %c0_23] : memref<2x32x96xf32, #tpu.memory_space<vmem>>, vector<1x32x96xf32>
    %34 = vector.shape_cast %33 : vector<1x32x96xf32> to vector<32x96xf32>
    %cst_24 = arith.constant dense<0.000000e+00> : vector<8x96xf32>
    %35 = tpu.matmul %32, %34, %cst_24 {dimension_numbers = #tpu.dot_dimension_numbers<[1], [0], [0], [1], [0, 0, 1, 1], [], []>} : vector<8x32xf32>, vector<32x96xf32>, vector<8x96xf32> -> vector<8x96xf32>
    %c0_25 = arith.constant 0 : index
    %c0_26 = arith.constant 0 : index
    %c0_27 = arith.constant 0 : index
    %36 = vector.load %arg8[%c0_25, %c0_26, %c0_27] : memref<2x1x96xf32, #tpu.memory_space<vmem>>, vector<1x1x96xf32>
    %37 = vector.shape_cast %36 : vector<1x1x96xf32> to vector<1x96xf32>
    %38 = vector.broadcast %37 : vector<1x96xf32> to vector<8x96xf32>
    %39 = arith.addf %35, %38 : vector<8x96xf32>
    %40 = vector.extract_strided_slice %39 {offsets = [0, 0], sizes = [8, 32], strides = [1, 1]} : vector<8x96xf32> to vector<8x32xf32>
    %41 = vector.extract_strided_slice %39 {offsets = [0, 32], sizes = [8, 32], strides = [1, 1]} : vector<8x96xf32> to vector<8x32xf32>
    %42 = vector.extract_strided_slice %39 {offsets = [0, 64], sizes = [8, 32], strides = [1, 1]} : vector<8x96xf32> to vector<8x32xf32>
    %cst_28 = arith.constant 3.200000e+01 : f32
    %43 = math.sqrt %cst_28 : f32
    %cst_29 = arith.constant 1.000000e+00 : f32
    %44 = arith.divf %cst_29, %43 : f32
    %cst_30 = arith.constant dense<0.000000e+00> : vector<8x8xf32>
    %45 = tpu.matmul %40, %41, %cst_30 {dimension_numbers = #tpu.dot_dimension_numbers<[1], [1], [0], [0], [0, 0, 1, 0], [], []>} : vector<8x32xf32>, vector<8x32xf32>, vector<8x8xf32> -> vector<8x8xf32>
    %46 = vector.broadcast %44 : f32 to vector<8x8xf32>
    %47 = arith.mulf %45, %46 : vector<8x8xf32>
    %cst_31 = arith.constant 0.000000e+00 : f32
    %48 = vector.broadcast %cst_31 : f32 to vector<8x8xf32>
    %49 = arith.cmpf oeq, %7, %48 : vector<8x8xf32>
    %cst_32 = arith.constant -1.000000e+09 : f32
    %50 = vector.broadcast %cst_32 : f32 to vector<8x8xf32>
    %51 = arith.select %49, %50, %47 : vector<8x8xi1>, vector<8x8xf32>
    %cst_33 = arith.constant dense<0xFF800000> : vector<8xf32>
    %52 = vector.multi_reduction <maximumf>, %51, %cst_33 [1] : vector<8x8xf32> to vector<8xf32>
    %53 = vector.shape_cast %52 : vector<8xf32> to vector<8x1xf32>
    %54 = vector.broadcast %53 : vector<8x1xf32> to vector<8x8xf32>
    %55 = arith.subf %51, %54 : vector<8x8xf32>
    %56 = math.exp %55 : vector<8x8xf32>
    %cst_34 = arith.constant dense<0.000000e+00> : vector<8xf32>
    %57 = vector.multi_reduction <add>, %56, %cst_34 [1] : vector<8x8xf32> to vector<8xf32>
    %58 = vector.shape_cast %57 : vector<8xf32> to vector<8x1xf32>
    %59 = tpu.reciprocal %58 {approx = true} : vector<8x1xf32> -> vector<8x1xf32>
    %60 = vector.broadcast %59 : vector<8x1xf32> to vector<8x8xf32>
    %61 = arith.mulf %56, %60 : vector<8x8xf32>
    %cst_35 = arith.constant dense<0.000000e+00> : vector<8x32xf32>
    %62 = tpu.matmul %61, %42, %cst_35 {dimension_numbers = #tpu.dot_dimension_numbers<[1], [0], [0], [1], [0, 0, 1, 1], [], []>} : vector<8x8xf32>, vector<8x32xf32>, vector<8x32xf32> -> vector<8x32xf32>
    %c0_36 = arith.constant 0 : index
    %c0_37 = arith.constant 0 : index
    %c0_38 = arith.constant 0 : index
    %63 = vector.load %arg9[%c0_36, %c0_37, %c0_38] : memref<2x32x32xf32, #tpu.memory_space<vmem>>, vector<1x32x32xf32>
    %64 = vector.shape_cast %63 : vector<1x32x32xf32> to vector<32x32xf32>
    %cst_39 = arith.constant dense<0.000000e+00> : vector<8x32xf32>
    %65 = tpu.matmul %62, %64, %cst_39 {dimension_numbers = #tpu.dot_dimension_numbers<[1], [0], [0], [1], [0, 0, 1, 1], [], []>} : vector<8x32xf32>, vector<32x32xf32>, vector<8x32xf32> -> vector<8x32xf32>
    %c0_40 = arith.constant 0 : index
    %c0_41 = arith.constant 0 : index
    %c0_42 = arith.constant 0 : index
    %66 = vector.load %arg10[%c0_40, %c0_41, %c0_42] : memref<2x1x32xf32, #tpu.memory_space<vmem>>, vector<1x1x32xf32>
    %67 = vector.shape_cast %66 : vector<1x1x32xf32> to vector<1x32xf32>
    %68 = vector.broadcast %67 : vector<1x32xf32> to vector<8x32xf32>
    %69 = arith.addf %65, %68 : vector<8x32xf32>
    %70 = arith.addf %1, %69 : vector<8x32xf32>
    %c0_43 = arith.constant 0 : index
    %c0_44 = arith.constant 0 : index
    %c0_45 = arith.constant 0 : index
    %71 = vector.load %arg11[%c0_43, %c0_44, %c0_45] : memref<2x1x32xf32, #tpu.memory_space<vmem>>, vector<1x1x32xf32>
    %72 = vector.shape_cast %71 : vector<1x1x32xf32> to vector<1x32xf32>
    %c0_46 = arith.constant 0 : index
    %c0_47 = arith.constant 0 : index
    %c0_48 = arith.constant 0 : index
    %73 = vector.load %arg12[%c0_46, %c0_47, %c0_48] : memref<2x1x32xf32, #tpu.memory_space<vmem>>, vector<1x1x32xf32>
    %74 = vector.shape_cast %73 : vector<1x1x32xf32> to vector<1x32xf32>
    %cst_49 = arith.constant dense<0.000000e+00> : vector<8xf32>
    %75 = vector.multi_reduction <add>, %70, %cst_49 [1] : vector<8x32xf32> to vector<8xf32>
    %76 = vector.shape_cast %75 : vector<8xf32> to vector<8x1xf32>
    %cst_50 = arith.constant 3.125000e-02 : f32
    %77 = vector.broadcast %cst_50 : f32 to vector<8x1xf32>
    %78 = arith.mulf %76, %77 : vector<8x1xf32>
    %79 = vector.broadcast %78 : vector<8x1xf32> to vector<8x32xf32>
    %80 = arith.subf %70, %79 : vector<8x32xf32>
    %81 = arith.mulf %80, %80 : vector<8x32xf32>
    %cst_51 = arith.constant dense<0.000000e+00> : vector<8xf32>
    %82 = vector.multi_reduction <add>, %81, %cst_51 [1] : vector<8x32xf32> to vector<8xf32>
    %83 = vector.shape_cast %82 : vector<8xf32> to vector<8x1xf32>
    %cst_52 = arith.constant 0.0322580636 : f32
    %84 = vector.broadcast %cst_52 : f32 to vector<8x1xf32>
    %85 = arith.mulf %83, %84 : vector<8x1xf32>
    %86 = math.sqrt %85 : vector<8x1xf32>
    %cst_53 = arith.constant 9.99999997E-7 : f32
    %87 = vector.broadcast %cst_53 : f32 to vector<8x1xf32>
    %88 = arith.addf %86, %87 : vector<8x1xf32>
    %89 = tpu.reciprocal %88 : vector<8x1xf32> -> vector<8x1xf32>
    %90 = vector.broadcast %89 : vector<8x1xf32> to vector<8x32xf32>
    %91 = arith.mulf %80, %90 : vector<8x32xf32>
    %92 = vector.broadcast %72 : vector<1x32xf32> to vector<8x32xf32>
    %93 = arith.mulf %91, %92 : vector<8x32xf32>
    %94 = vector.broadcast %74 : vector<1x32xf32> to vector<8x32xf32>
    %95 = arith.addf %93, %94 : vector<8x32xf32>
    %c0_54 = arith.constant 0 : index
    %c0_55 = arith.constant 0 : index
    %c0_56 = arith.constant 0 : index
    %96 = vector.load %arg13[%c0_54, %c0_55, %c0_56] : memref<2x32x32xf32, #tpu.memory_space<vmem>>, vector<1x32x32xf32>
    %97 = vector.shape_cast %96 : vector<1x32x32xf32> to vector<32x32xf32>
    %cst_57 = arith.constant dense<0.000000e+00> : vector<8x32xf32>
    %98 = tpu.matmul %95, %97, %cst_57 {dimension_numbers = #tpu.dot_dimension_numbers<[1], [0], [0], [1], [0, 0, 1, 1], [], []>} : vector<8x32xf32>, vector<32x32xf32>, vector<8x32xf32> -> vector<8x32xf32>
    %c0_58 = arith.constant 0 : index
    %c0_59 = arith.constant 0 : index
    %c0_60 = arith.constant 0 : index
    %99 = vector.load %arg14[%c0_58, %c0_59, %c0_60] : memref<2x1x32xf32, #tpu.memory_space<vmem>>, vector<1x1x32xf32>
    %100 = vector.shape_cast %99 : vector<1x1x32xf32> to vector<1x32xf32>
    %101 = vector.broadcast %100 : vector<1x32xf32> to vector<8x32xf32>
    %102 = arith.addf %98, %101 : vector<8x32xf32>
    %c0_61 = arith.constant 0 : index
    %c0_62 = arith.constant 0 : index
    %c0_63 = arith.constant 0 : index
    %103 = vector.load %arg15[%c0_61, %c0_62, %c0_63] : memref<2x32x64xf32, #tpu.memory_space<vmem>>, vector<1x32x64xf32>
    %104 = vector.shape_cast %103 : vector<1x32x64xf32> to vector<32x64xf32>
    %cst_64 = arith.constant dense<0.000000e+00> : vector<8x64xf32>
    %105 = tpu.matmul %3, %104, %cst_64 {dimension_numbers = #tpu.dot_dimension_numbers<[1], [0], [0], [1], [0, 0, 1, 1], [], []>} : vector<8x32xf32>, vector<32x64xf32>, vector<8x64xf32> -> vector<8x64xf32>
    %c0_65 = arith.constant 0 : index
    %c0_66 = arith.constant 0 : index
    %c0_67 = arith.constant 0 : index
    %106 = vector.load %arg16[%c0_65, %c0_66, %c0_67] : memref<2x1x64xf32, #tpu.memory_space<vmem>>, vector<1x1x64xf32>
    %107 = vector.shape_cast %106 : vector<1x1x64xf32> to vector<1x64xf32>
    %108 = vector.broadcast %107 : vector<1x64xf32> to vector<8x64xf32>
    %109 = arith.addf %105, %108 : vector<8x64xf32>
    %110 = vector.extract_strided_slice %109 {offsets = [0, 0], sizes = [8, 32], strides = [1, 1]} : vector<8x64xf32> to vector<8x32xf32>
    %111 = vector.extract_strided_slice %109 {offsets = [0, 32], sizes = [8, 32], strides = [1, 1]} : vector<8x64xf32> to vector<8x32xf32>
    %cst_68 = arith.constant 3.200000e+01 : f32
    %112 = math.sqrt %cst_68 : f32
    %cst_69 = arith.constant 1.000000e+00 : f32
    %113 = arith.divf %cst_69, %112 : f32
    %cst_70 = arith.constant dense<0.000000e+00> : vector<8x8xf32>
    %114 = tpu.matmul %102, %110, %cst_70 {dimension_numbers = #tpu.dot_dimension_numbers<[1], [1], [0], [0], [0, 0, 1, 0], [], []>} : vector<8x32xf32>, vector<8x32xf32>, vector<8x8xf32> -> vector<8x8xf32>
    %115 = vector.broadcast %113 : f32 to vector<8x8xf32>
    %116 = arith.mulf %114, %115 : vector<8x8xf32>
    %cst_71 = arith.constant 0.000000e+00 : f32
    %117 = vector.broadcast %cst_71 : f32 to vector<1x8xf32>
    %118 = arith.cmpf oeq, %5, %117 : vector<1x8xf32>
    %cst_72 = arith.constant -1.000000e+09 : f32
    %119 = vector.shape_cast %118 : vector<1x8xi1> to vector<1x8xi1>
    %120 = vector.broadcast %119 : vector<1x8xi1> to vector<8x8xi1>
    %121 = vector.broadcast %cst_72 : f32 to vector<8x8xf32>
    %122 = arith.select %120, %121, %116 : vector<8x8xi1>, vector<8x8xf32>
    %cst_73 = arith.constant dense<0xFF800000> : vector<8xf32>
    %123 = vector.multi_reduction <maximumf>, %122, %cst_73 [1] : vector<8x8xf32> to vector<8xf32>
    %124 = vector.shape_cast %123 : vector<8xf32> to vector<8x1xf32>
    %125 = vector.broadcast %124 : vector<8x1xf32> to vector<8x8xf32>
    %126 = arith.subf %122, %125 : vector<8x8xf32>
    %127 = math.exp %126 : vector<8x8xf32>
    %cst_74 = arith.constant dense<0.000000e+00> : vector<8xf32>
    %128 = vector.multi_reduction <add>, %127, %cst_74 [1] : vector<8x8xf32> to vector<8xf32>
    %129 = vector.shape_cast %128 : vector<8xf32> to vector<8x1xf32>
    %130 = tpu.reciprocal %129 {approx = true} : vector<8x1xf32> -> vector<8x1xf32>
    %131 = vector.broadcast %130 : vector<8x1xf32> to vector<8x8xf32>
    %132 = arith.mulf %127, %131 : vector<8x8xf32>
    %cst_75 = arith.constant dense<0.000000e+00> : vector<8x32xf32>
    %133 = tpu.matmul %132, %111, %cst_75 {dimension_numbers = #tpu.dot_dimension_numbers<[1], [0], [0], [1], [0, 0, 1, 1], [], []>} : vector<8x8xf32>, vector<8x32xf32>, vector<8x32xf32> -> vector<8x32xf32>
    %c0_76 = arith.constant 0 : index
    %c0_77 = arith.constant 0 : index
    %c0_78 = arith.constant 0 : index
    %134 = vector.load %arg17[%c0_76, %c0_77, %c0_78] : memref<2x32x32xf32, #tpu.memory_space<vmem>>, vector<1x32x32xf32>
    %135 = vector.shape_cast %134 : vector<1x32x32xf32> to vector<32x32xf32>
    %cst_79 = arith.constant dense<0.000000e+00> : vector<8x32xf32>
    %136 = tpu.matmul %133, %135, %cst_79 {dimension_numbers = #tpu.dot_dimension_numbers<[1], [0], [0], [1], [0, 0, 1, 1], [], []>} : vector<8x32xf32>, vector<32x32xf32>, vector<8x32xf32> -> vector<8x32xf32>
    %c0_80 = arith.constant 0 : index
    %c0_81 = arith.constant 0 : index
    %c0_82 = arith.constant 0 : index
    %137 = vector.load %arg18[%c0_80, %c0_81, %c0_82] : memref<2x1x32xf32, #tpu.memory_space<vmem>>, vector<1x1x32xf32>
    %138 = vector.shape_cast %137 : vector<1x1x32xf32> to vector<1x32xf32>
    %139 = vector.broadcast %138 : vector<1x32xf32> to vector<8x32xf32>
    %140 = arith.addf %136, %139 : vector<8x32xf32>
    %141 = arith.addf %70, %140 : vector<8x32xf32>
    %c0_83 = arith.constant 0 : index
    %c0_84 = arith.constant 0 : index
    %c0_85 = arith.constant 0 : index
    %142 = vector.load %arg19[%c0_83, %c0_84, %c0_85] : memref<2x1x32xf32, #tpu.memory_space<vmem>>, vector<1x1x32xf32>
    %143 = vector.shape_cast %142 : vector<1x1x32xf32> to vector<1x32xf32>
    %c0_86 = arith.constant 0 : index
    %c0_87 = arith.constant 0 : index
    %c0_88 = arith.constant 0 : index
    %144 = vector.load %arg20[%c0_86, %c0_87, %c0_88] : memref<2x1x32xf32, #tpu.memory_space<vmem>>, vector<1x1x32xf32>
    %145 = vector.shape_cast %144 : vector<1x1x32xf32> to vector<1x32xf32>
    %cst_89 = arith.constant dense<0.000000e+00> : vector<8xf32>
    %146 = vector.multi_reduction <add>, %141, %cst_89 [1] : vector<8x32xf32> to vector<8xf32>
    %147 = vector.shape_cast %146 : vector<8xf32> to vector<8x1xf32>
    %cst_90 = arith.constant 3.125000e-02 : f32
    %148 = vector.broadcast %cst_90 : f32 to vector<8x1xf32>
    %149 = arith.mulf %147, %148 : vector<8x1xf32>
    %150 = vector.broadcast %149 : vector<8x1xf32> to vector<8x32xf32>
    %151 = arith.subf %141, %150 : vector<8x32xf32>
    %152 = arith.mulf %151, %151 : vector<8x32xf32>
    %cst_91 = arith.constant dense<0.000000e+00> : vector<8xf32>
    %153 = vector.multi_reduction <add>, %152, %cst_91 [1] : vector<8x32xf32> to vector<8xf32>
    %154 = vector.shape_cast %153 : vector<8xf32> to vector<8x1xf32>
    %cst_92 = arith.constant 0.0322580636 : f32
    %155 = vector.broadcast %cst_92 : f32 to vector<8x1xf32>
    %156 = arith.mulf %154, %155 : vector<8x1xf32>
    %157 = math.sqrt %156 : vector<8x1xf32>
    %cst_93 = arith.constant 9.99999997E-7 : f32
    %158 = vector.broadcast %cst_93 : f32 to vector<8x1xf32>
    %159 = arith.addf %157, %158 : vector<8x1xf32>
    %160 = tpu.reciprocal %159 : vector<8x1xf32> -> vector<8x1xf32>
    %161 = vector.broadcast %160 : vector<8x1xf32> to vector<8x32xf32>
    %162 = arith.mulf %151, %161 : vector<8x32xf32>
    %163 = vector.broadcast %143 : vector<1x32xf32> to vector<8x32xf32>
    %164 = arith.mulf %162, %163 : vector<8x32xf32>
    %165 = vector.broadcast %145 : vector<1x32xf32> to vector<8x32xf32>
    %166 = arith.addf %164, %165 : vector<8x32xf32>
    %c0_94 = arith.constant 0 : index
    %c0_95 = arith.constant 0 : index
    %c0_96 = arith.constant 0 : index
    %167 = vector.load %arg21[%c0_94, %c0_95, %c0_96] : memref<2x32x64xf32, #tpu.memory_space<vmem>>, vector<1x32x64xf32>
    %168 = vector.shape_cast %167 : vector<1x32x64xf32> to vector<32x64xf32>
    %cst_97 = arith.constant dense<0.000000e+00> : vector<8x64xf32>
    %169 = tpu.matmul %166, %168, %cst_97 {dimension_numbers = #tpu.dot_dimension_numbers<[1], [0], [0], [1], [0, 0, 1, 1], [], []>} : vector<8x32xf32>, vector<32x64xf32>, vector<8x64xf32> -> vector<8x64xf32>
    %c0_98 = arith.constant 0 : index
    %c0_99 = arith.constant 0 : index
    %c0_100 = arith.constant 0 : index
    %170 = vector.load %arg22[%c0_98, %c0_99, %c0_100] : memref<2x1x64xf32, #tpu.memory_space<vmem>>, vector<1x1x64xf32>
    %171 = vector.shape_cast %170 : vector<1x1x64xf32> to vector<1x64xf32>
    %172 = vector.broadcast %171 : vector<1x64xf32> to vector<8x64xf32>
    %173 = arith.addf %169, %172 : vector<8x64xf32>
    %cst_101 = arith.constant 0.000000e+00 : f32
    %174 = vector.broadcast %cst_101 : f32 to vector<8x64xf32>
    %175 = arith.maximumf %173, %174 : vector<8x64xf32>
    %c0_102 = arith.constant 0 : index
    %c0_103 = arith.constant 0 : index
    %c0_104 = arith.constant 0 : index
    %176 = vector.load %arg23[%c0_102, %c0_103, %c0_104] : memref<2x64x32xf32, #tpu.memory_space<vmem>>, vector<1x64x32xf32>
    %177 = vector.shape_cast %176 : vector<1x64x32xf32> to vector<64x32xf32>
    %cst_105 = arith.constant dense<0.000000e+00> : vector<8x32xf32>
    %178 = tpu.matmul %175, %177, %cst_105 {dimension_numbers = #tpu.dot_dimension_numbers<[1], [0], [0], [1], [0, 0, 1, 1], [], []>} : vector<8x64xf32>, vector<64x32xf32>, vector<8x32xf32> -> vector<8x32xf32>
    %c0_106 = arith.constant 0 : index
    %c0_107 = arith.constant 0 : index
    %c0_108 = arith.constant 0 : index
    %179 = vector.load %arg24[%c0_106, %c0_107, %c0_108] : memref<2x1x32xf32, #tpu.memory_space<vmem>>, vector<1x1x32xf32>
    %180 = vector.shape_cast %179 : vector<1x1x32xf32> to vector<1x32xf32>
    %181 = vector.broadcast %180 : vector<1x32xf32> to vector<8x32xf32>
    %182 = arith.addf %178, %181 : vector<8x32xf32>
    %183 = arith.addf %141, %182 : vector<8x32xf32>
    %c1 = arith.constant 1 : index
    %c0_109 = arith.constant 0 : index
    %c0_110 = arith.constant 0 : index
    %184 = vector.load %arg5[%c1, %c0_109, %c0_110] : memref<2x1x32xf32, #tpu.memory_space<vmem>>, vector<1x1x32xf32>
    %185 = vector.shape_cast %184 : vector<1x1x32xf32> to vector<1x32xf32>
    %c1_111 = arith.constant 1 : index
    %c0_112 = arith.constant 0 : index
    %c0_113 = arith.constant 0 : index
    %186 = vector.load %arg6[%c1_111, %c0_112, %c0_113] : memref<2x1x32xf32, #tpu.memory_space<vmem>>, vector<1x1x32xf32>
    %187 = vector.shape_cast %186 : vector<1x1x32xf32> to vector<1x32xf32>
    %cst_114 = arith.constant dense<0.000000e+00> : vector<8xf32>
    %188 = vector.multi_reduction <add>, %183, %cst_114 [1] : vector<8x32xf32> to vector<8xf32>
    %189 = vector.shape_cast %188 : vector<8xf32> to vector<8x1xf32>
    %cst_115 = arith.constant 3.125000e-02 : f32
    %190 = vector.broadcast %cst_115 : f32 to vector<8x1xf32>
    %191 = arith.mulf %189, %190 : vector<8x1xf32>
    %192 = vector.broadcast %191 : vector<8x1xf32> to vector<8x32xf32>
    %193 = arith.subf %183, %192 : vector<8x32xf32>
    %194 = arith.mulf %193, %193 : vector<8x32xf32>
    %cst_116 = arith.constant dense<0.000000e+00> : vector<8xf32>
    %195 = vector.multi_reduction <add>, %194, %cst_116 [1] : vector<8x32xf32> to vector<8xf32>
    %196 = vector.shape_cast %195 : vector<8xf32> to vector<8x1xf32>
    %cst_117 = arith.constant 0.0322580636 : f32
    %197 = vector.broadcast %cst_117 : f32 to vector<8x1xf32>
    %198 = arith.mulf %196, %197 : vector<8x1xf32>
    %199 = math.sqrt %198 : vector<8x1xf32>
    %cst_118 = arith.constant 9.99999997E-7 : f32
    %200 = vector.broadcast %cst_118 : f32 to vector<8x1xf32>
    %201 = arith.addf %199, %200 : vector<8x1xf32>
    %202 = tpu.reciprocal %201 : vector<8x1xf32> -> vector<8x1xf32>
    %203 = vector.broadcast %202 : vector<8x1xf32> to vector<8x32xf32>
    %204 = arith.mulf %193, %203 : vector<8x32xf32>
    %205 = vector.broadcast %185 : vector<1x32xf32> to vector<8x32xf32>
    %206 = arith.mulf %204, %205 : vector<8x32xf32>
    %207 = vector.broadcast %187 : vector<1x32xf32> to vector<8x32xf32>
    %208 = arith.addf %206, %207 : vector<8x32xf32>
    %c1_119 = arith.constant 1 : index
    %c0_120 = arith.constant 0 : index
    %c0_121 = arith.constant 0 : index
    %209 = vector.load %arg7[%c1_119, %c0_120, %c0_121] : memref<2x32x96xf32, #tpu.memory_space<vmem>>, vector<1x32x96xf32>
    %210 = vector.shape_cast %209 : vector<1x32x96xf32> to vector<32x96xf32>
    %cst_122 = arith.constant dense<0.000000e+00> : vector<8x96xf32>
    %211 = tpu.matmul %208, %210, %cst_122 {dimension_numbers = #tpu.dot_dimension_numbers<[1], [0], [0], [1], [0, 0, 1, 1], [], []>} : vector<8x32xf32>, vector<32x96xf32>, vector<8x96xf32> -> vector<8x96xf32>
    %c1_123 = arith.constant 1 : index
    %c0_124 = arith.constant 0 : index
    %c0_125 = arith.constant 0 : index
    %212 = vector.load %arg8[%c1_123, %c0_124, %c0_125] : memref<2x1x96xf32, #tpu.memory_space<vmem>>, vector<1x1x96xf32>
    %213 = vector.shape_cast %212 : vector<1x1x96xf32> to vector<1x96xf32>
    %214 = vector.broadcast %213 : vector<1x96xf32> to vector<8x96xf32>
    %215 = arith.addf %211, %214 : vector<8x96xf32>
    %216 = vector.extract_strided_slice %215 {offsets = [0, 0], sizes = [8, 32], strides = [1, 1]} : vector<8x96xf32> to vector<8x32xf32>
    %217 = vector.extract_strided_slice %215 {offsets = [0, 32], sizes = [8, 32], strides = [1, 1]} : vector<8x96xf32> to vector<8x32xf32>
    %218 = vector.extract_strided_slice %215 {offsets = [0, 64], sizes = [8, 32], strides = [1, 1]} : vector<8x96xf32> to vector<8x32xf32>
    %cst_126 = arith.constant 3.200000e+01 : f32
    %219 = math.sqrt %cst_126 : f32
    %cst_127 = arith.constant 1.000000e+00 : f32
    %220 = arith.divf %cst_127, %219 : f32
    %cst_128 = arith.constant dense<0.000000e+00> : vector<8x8xf32>
    %221 = tpu.matmul %216, %217, %cst_128 {dimension_numbers = #tpu.dot_dimension_numbers<[1], [1], [0], [0], [0, 0, 1, 0], [], []>} : vector<8x32xf32>, vector<8x32xf32>, vector<8x8xf32> -> vector<8x8xf32>
    %222 = vector.broadcast %220 : f32 to vector<8x8xf32>
    %223 = arith.mulf %221, %222 : vector<8x8xf32>
    %cst_129 = arith.constant 0.000000e+00 : f32
    %224 = vector.broadcast %cst_129 : f32 to vector<8x8xf32>
    %225 = arith.cmpf oeq, %7, %224 : vector<8x8xf32>
    %cst_130 = arith.constant -1.000000e+09 : f32
    %226 = vector.broadcast %cst_130 : f32 to vector<8x8xf32>
    %227 = arith.select %225, %226, %223 : vector<8x8xi1>, vector<8x8xf32>
    %cst_131 = arith.constant dense<0xFF800000> : vector<8xf32>
    %228 = vector.multi_reduction <maximumf>, %227, %cst_131 [1] : vector<8x8xf32> to vector<8xf32>
    %229 = vector.shape_cast %228 : vector<8xf32> to vector<8x1xf32>
    %230 = vector.broadcast %229 : vector<8x1xf32> to vector<8x8xf32>
    %231 = arith.subf %227, %230 : vector<8x8xf32>
    %232 = math.exp %231 : vector<8x8xf32>
    %cst_132 = arith.constant dense<0.000000e+00> : vector<8xf32>
    %233 = vector.multi_reduction <add>, %232, %cst_132 [1] : vector<8x8xf32> to vector<8xf32>
    %234 = vector.shape_cast %233 : vector<8xf32> to vector<8x1xf32>
    %235 = tpu.reciprocal %234 {approx = true} : vector<8x1xf32> -> vector<8x1xf32>
    %236 = vector.broadcast %235 : vector<8x1xf32> to vector<8x8xf32>
    %237 = arith.mulf %232, %236 : vector<8x8xf32>
    %cst_133 = arith.constant dense<0.000000e+00> : vector<8x32xf32>
    %238 = tpu.matmul %237, %218, %cst_133 {dimension_numbers = #tpu.dot_dimension_numbers<[1], [0], [0], [1], [0, 0, 1, 1], [], []>} : vector<8x8xf32>, vector<8x32xf32>, vector<8x32xf32> -> vector<8x32xf32>
    %c1_134 = arith.constant 1 : index
    %c0_135 = arith.constant 0 : index
    %c0_136 = arith.constant 0 : index
    %239 = vector.load %arg9[%c1_134, %c0_135, %c0_136] : memref<2x32x32xf32, #tpu.memory_space<vmem>>, vector<1x32x32xf32>
    %240 = vector.shape_cast %239 : vector<1x32x32xf32> to vector<32x32xf32>
    %cst_137 = arith.constant dense<0.000000e+00> : vector<8x32xf32>
    %241 = tpu.matmul %238, %240, %cst_137 {dimension_numbers = #tpu.dot_dimension_numbers<[1], [0], [0], [1], [0, 0, 1, 1], [], []>} : vector<8x32xf32>, vector<32x32xf32>, vector<8x32xf32> -> vector<8x32xf32>
    %c1_138 = arith.constant 1 : index
    %c0_139 = arith.constant 0 : index
    %c0_140 = arith.constant 0 : index
    %242 = vector.load %arg10[%c1_138, %c0_139, %c0_140] : memref<2x1x32xf32, #tpu.memory_space<vmem>>, vector<1x1x32xf32>
    %243 = vector.shape_cast %242 : vector<1x1x32xf32> to vector<1x32xf32>
    %244 = vector.broadcast %243 : vector<1x32xf32> to vector<8x32xf32>
    %245 = arith.addf %241, %244 : vector<8x32xf32>
    %246 = arith.addf %183, %245 : vector<8x32xf32>
    %c1_141 = arith.constant 1 : index
    %c0_142 = arith.constant 0 : index
    %c0_143 = arith.constant 0 : index
    %247 = vector.load %arg11[%c1_141, %c0_142, %c0_143] : memref<2x1x32xf32, #tpu.memory_space<vmem>>, vector<1x1x32xf32>
    %248 = vector.shape_cast %247 : vector<1x1x32xf32> to vector<1x32xf32>
    %c1_144 = arith.constant 1 : index
    %c0_145 = arith.constant 0 : index
    %c0_146 = arith.constant 0 : index
    %249 = vector.load %arg12[%c1_144, %c0_145, %c0_146] : memref<2x1x32xf32, #tpu.memory_space<vmem>>, vector<1x1x32xf32>
    %250 = vector.shape_cast %249 : vector<1x1x32xf32> to vector<1x32xf32>
    %cst_147 = arith.constant dense<0.000000e+00> : vector<8xf32>
    %251 = vector.multi_reduction <add>, %246, %cst_147 [1] : vector<8x32xf32> to vector<8xf32>
    %252 = vector.shape_cast %251 : vector<8xf32> to vector<8x1xf32>
    %cst_148 = arith.constant 3.125000e-02 : f32
    %253 = vector.broadcast %cst_148 : f32 to vector<8x1xf32>
    %254 = arith.mulf %252, %253 : vector<8x1xf32>
    %255 = vector.broadcast %254 : vector<8x1xf32> to vector<8x32xf32>
    %256 = arith.subf %246, %255 : vector<8x32xf32>
    %257 = arith.mulf %256, %256 : vector<8x32xf32>
    %cst_149 = arith.constant dense<0.000000e+00> : vector<8xf32>
    %258 = vector.multi_reduction <add>, %257, %cst_149 [1] : vector<8x32xf32> to vector<8xf32>
    %259 = vector.shape_cast %258 : vector<8xf32> to vector<8x1xf32>
    %cst_150 = arith.constant 0.0322580636 : f32
    %260 = vector.broadcast %cst_150 : f32 to vector<8x1xf32>
    %261 = arith.mulf %259, %260 : vector<8x1xf32>
    %262 = math.sqrt %261 : vector<8x1xf32>
    %cst_151 = arith.constant 9.99999997E-7 : f32
    %263 = vector.broadcast %cst_151 : f32 to vector<8x1xf32>
    %264 = arith.addf %262, %263 : vector<8x1xf32>
    %265 = tpu.reciprocal %264 : vector<8x1xf32> -> vector<8x1xf32>
    %266 = vector.broadcast %265 : vector<8x1xf32> to vector<8x32xf32>
    %267 = arith.mulf %256, %266 : vector<8x32xf32>
    %268 = vector.broadcast %248 : vector<1x32xf32> to vector<8x32xf32>
    %269 = arith.mulf %267, %268 : vector<8x32xf32>
    %270 = vector.broadcast %250 : vector<1x32xf32> to vector<8x32xf32>
    %271 = arith.addf %269, %270 : vector<8x32xf32>
    %c1_152 = arith.constant 1 : index
    %c0_153 = arith.constant 0 : index
    %c0_154 = arith.constant 0 : index
    %272 = vector.load %arg13[%c1_152, %c0_153, %c0_154] : memref<2x32x32xf32, #tpu.memory_space<vmem>>, vector<1x32x32xf32>
    %273 = vector.shape_cast %272 : vector<1x32x32xf32> to vector<32x32xf32>
    %cst_155 = arith.constant dense<0.000000e+00> : vector<8x32xf32>
    %274 = tpu.matmul %271, %273, %cst_155 {dimension_numbers = #tpu.dot_dimension_numbers<[1], [0], [0], [1], [0, 0, 1, 1], [], []>} : vector<8x32xf32>, vector<32x32xf32>, vector<8x32xf32> -> vector<8x32xf32>
    %c1_156 = arith.constant 1 : index
    %c0_157 = arith.constant 0 : index
    %c0_158 = arith.constant 0 : index
    %275 = vector.load %arg14[%c1_156, %c0_157, %c0_158] : memref<2x1x32xf32, #tpu.memory_space<vmem>>, vector<1x1x32xf32>
    %276 = vector.shape_cast %275 : vector<1x1x32xf32> to vector<1x32xf32>
    %277 = vector.broadcast %276 : vector<1x32xf32> to vector<8x32xf32>
    %278 = arith.addf %274, %277 : vector<8x32xf32>
    %c1_159 = arith.constant 1 : index
    %c0_160 = arith.constant 0 : index
    %c0_161 = arith.constant 0 : index
    %279 = vector.load %arg15[%c1_159, %c0_160, %c0_161] : memref<2x32x64xf32, #tpu.memory_space<vmem>>, vector<1x32x64xf32>
    %280 = vector.shape_cast %279 : vector<1x32x64xf32> to vector<32x64xf32>
    %cst_162 = arith.constant dense<0.000000e+00> : vector<8x64xf32>
    %281 = tpu.matmul %3, %280, %cst_162 {dimension_numbers = #tpu.dot_dimension_numbers<[1], [0], [0], [1], [0, 0, 1, 1], [], []>} : vector<8x32xf32>, vector<32x64xf32>, vector<8x64xf32> -> vector<8x64xf32>
    %c1_163 = arith.constant 1 : index
    %c0_164 = arith.constant 0 : index
    %c0_165 = arith.constant 0 : index
    %282 = vector.load %arg16[%c1_163, %c0_164, %c0_165] : memref<2x1x64xf32, #tpu.memory_space<vmem>>, vector<1x1x64xf32>
    %283 = vector.shape_cast %282 : vector<1x1x64xf32> to vector<1x64xf32>
    %284 = vector.broadcast %283 : vector<1x64xf32> to vector<8x64xf32>
    %285 = arith.addf %281, %284 : vector<8x64xf32>
    %286 = vector.extract_strided_slice %285 {offsets = [0, 0], sizes = [8, 32], strides = [1, 1]} : vector<8x64xf32> to vector<8x32xf32>
    %287 = vector.extract_strided_slice %285 {offsets = [0, 32], sizes = [8, 32], strides = [1, 1]} : vector<8x64xf32> to vector<8x32xf32>
    %cst_166 = arith.constant 3.200000e+01 : f32
    %288 = math.sqrt %cst_166 : f32
    %cst_167 = arith.constant 1.000000e+00 : f32
    %289 = arith.divf %cst_167, %288 : f32
    %cst_168 = arith.constant dense<0.000000e+00> : vector<8x8xf32>
    %290 = tpu.matmul %278, %286, %cst_168 {dimension_numbers = #tpu.dot_dimension_numbers<[1], [1], [0], [0], [0, 0, 1, 0], [], []>} : vector<8x32xf32>, vector<8x32xf32>, vector<8x8xf32> -> vector<8x8xf32>
    %291 = vector.broadcast %289 : f32 to vector<8x8xf32>
    %292 = arith.mulf %290, %291 : vector<8x8xf32>
    %cst_169 = arith.constant 0.000000e+00 : f32
    %293 = vector.broadcast %cst_169 : f32 to vector<1x8xf32>
    %294 = arith.cmpf oeq, %5, %293 : vector<1x8xf32>
    %cst_170 = arith.constant -1.000000e+09 : f32
    %295 = vector.shape_cast %294 : vector<1x8xi1> to vector<1x8xi1>
    %296 = vector.broadcast %295 : vector<1x8xi1> to vector<8x8xi1>
    %297 = vector.broadcast %cst_170 : f32 to vector<8x8xf32>
    %298 = arith.select %296, %297, %292 : vector<8x8xi1>, vector<8x8xf32>
    %cst_171 = arith.constant dense<0xFF800000> : vector<8xf32>
    %299 = vector.multi_reduction <maximumf>, %298, %cst_171 [1] : vector<8x8xf32> to vector<8xf32>
    %300 = vector.shape_cast %299 : vector<8xf32> to vector<8x1xf32>
    %301 = vector.broadcast %300 : vector<8x1xf32> to vector<8x8xf32>
    %302 = arith.subf %298, %301 : vector<8x8xf32>
    %303 = math.exp %302 : vector<8x8xf32>
    %cst_172 = arith.constant dense<0.000000e+00> : vector<8xf32>
    %304 = vector.multi_reduction <add>, %303, %cst_172 [1] : vector<8x8xf32> to vector<8xf32>
    %305 = vector.shape_cast %304 : vector<8xf32> to vector<8x1xf32>
    %306 = tpu.reciprocal %305 {approx = true} : vector<8x1xf32> -> vector<8x1xf32>
    %307 = vector.broadcast %306 : vector<8x1xf32> to vector<8x8xf32>
    %308 = arith.mulf %303, %307 : vector<8x8xf32>
    %cst_173 = arith.constant dense<0.000000e+00> : vector<8x32xf32>
    %309 = tpu.matmul %308, %287, %cst_173 {dimension_numbers = #tpu.dot_dimension_numbers<[1], [0], [0], [1], [0, 0, 1, 1], [], []>} : vector<8x8xf32>, vector<8x32xf32>, vector<8x32xf32> -> vector<8x32xf32>
    %c1_174 = arith.constant 1 : index
    %c0_175 = arith.constant 0 : index
    %c0_176 = arith.constant 0 : index
    %310 = vector.load %arg17[%c1_174, %c0_175, %c0_176] : memref<2x32x32xf32, #tpu.memory_space<vmem>>, vector<1x32x32xf32>
    %311 = vector.shape_cast %310 : vector<1x32x32xf32> to vector<32x32xf32>
    %cst_177 = arith.constant dense<0.000000e+00> : vector<8x32xf32>
    %312 = tpu.matmul %309, %311, %cst_177 {dimension_numbers = #tpu.dot_dimension_numbers<[1], [0], [0], [1], [0, 0, 1, 1], [], []>} : vector<8x32xf32>, vector<32x32xf32>, vector<8x32xf32> -> vector<8x32xf32>
    %c1_178 = arith.constant 1 : index
    %c0_179 = arith.constant 0 : index
    %c0_180 = arith.constant 0 : index
    %313 = vector.load %arg18[%c1_178, %c0_179, %c0_180] : memref<2x1x32xf32, #tpu.memory_space<vmem>>, vector<1x1x32xf32>
    %314 = vector.shape_cast %313 : vector<1x1x32xf32> to vector<1x32xf32>
    %315 = vector.broadcast %314 : vector<1x32xf32> to vector<8x32xf32>
    %316 = arith.addf %312, %315 : vector<8x32xf32>
    %317 = arith.addf %246, %316 : vector<8x32xf32>
    %c1_181 = arith.constant 1 : index
    %c0_182 = arith.constant 0 : index
    %c0_183 = arith.constant 0 : index
    %318 = vector.load %arg19[%c1_181, %c0_182, %c0_183] : memref<2x1x32xf32, #tpu.memory_space<vmem>>, vector<1x1x32xf32>
    %319 = vector.shape_cast %318 : vector<1x1x32xf32> to vector<1x32xf32>
    %c1_184 = arith.constant 1 : index
    %c0_185 = arith.constant 0 : index
    %c0_186 = arith.constant 0 : index
    %320 = vector.load %arg20[%c1_184, %c0_185, %c0_186] : memref<2x1x32xf32, #tpu.memory_space<vmem>>, vector<1x1x32xf32>
    %321 = vector.shape_cast %320 : vector<1x1x32xf32> to vector<1x32xf32>
    %cst_187 = arith.constant dense<0.000000e+00> : vector<8xf32>
    %322 = vector.multi_reduction <add>, %317, %cst_187 [1] : vector<8x32xf32> to vector<8xf32>
    %323 = vector.shape_cast %322 : vector<8xf32> to vector<8x1xf32>
    %cst_188 = arith.constant 3.125000e-02 : f32
    %324 = vector.broadcast %cst_188 : f32 to vector<8x1xf32>
    %325 = arith.mulf %323, %324 : vector<8x1xf32>
    %326 = vector.broadcast %325 : vector<8x1xf32> to vector<8x32xf32>
    %327 = arith.subf %317, %326 : vector<8x32xf32>
    %328 = arith.mulf %327, %327 : vector<8x32xf32>
    %cst_189 = arith.constant dense<0.000000e+00> : vector<8xf32>
    %329 = vector.multi_reduction <add>, %328, %cst_189 [1] : vector<8x32xf32> to vector<8xf32>
    %330 = vector.shape_cast %329 : vector<8xf32> to vector<8x1xf32>
    %cst_190 = arith.constant 0.0322580636 : f32
    %331 = vector.broadcast %cst_190 : f32 to vector<8x1xf32>
    %332 = arith.mulf %330, %331 : vector<8x1xf32>
    %333 = math.sqrt %332 : vector<8x1xf32>
    %cst_191 = arith.constant 9.99999997E-7 : f32
    %334 = vector.broadcast %cst_191 : f32 to vector<8x1xf32>
    %335 = arith.addf %333, %334 : vector<8x1xf32>
    %336 = tpu.reciprocal %335 : vector<8x1xf32> -> vector<8x1xf32>
    %337 = vector.broadcast %336 : vector<8x1xf32> to vector<8x32xf32>
    %338 = arith.mulf %327, %337 : vector<8x32xf32>
    %339 = vector.broadcast %319 : vector<1x32xf32> to vector<8x32xf32>
    %340 = arith.mulf %338, %339 : vector<8x32xf32>
    %341 = vector.broadcast %321 : vector<1x32xf32> to vector<8x32xf32>
    %342 = arith.addf %340, %341 : vector<8x32xf32>
    %c1_192 = arith.constant 1 : index
    %c0_193 = arith.constant 0 : index
    %c0_194 = arith.constant 0 : index
    %343 = vector.load %arg21[%c1_192, %c0_193, %c0_194] : memref<2x32x64xf32, #tpu.memory_space<vmem>>, vector<1x32x64xf32>
    %344 = vector.shape_cast %343 : vector<1x32x64xf32> to vector<32x64xf32>
    %cst_195 = arith.constant dense<0.000000e+00> : vector<8x64xf32>
    %345 = tpu.matmul %342, %344, %cst_195 {dimension_numbers = #tpu.dot_dimension_numbers<[1], [0], [0], [1], [0, 0, 1, 1], [], []>} : vector<8x32xf32>, vector<32x64xf32>, vector<8x64xf32> -> vector<8x64xf32>
    %c1_196 = arith.constant 1 : index
    %c0_197 = arith.constant 0 : index
    %c0_198 = arith.constant 0 : index
    %346 = vector.load %arg22[%c1_196, %c0_197, %c0_198] : memref<2x1x64xf32, #tpu.memory_space<vmem>>, vector<1x1x64xf32>
    %347 = vector.shape_cast %346 : vector<1x1x64xf32> to vector<1x64xf32>
    %348 = vector.broadcast %347 : vector<1x64xf32> to vector<8x64xf32>
    %349 = arith.addf %345, %348 : vector<8x64xf32>
    %cst_199 = arith.constant 0.000000e+00 : f32
    %350 = vector.broadcast %cst_199 : f32 to vector<8x64xf32>
    %351 = arith.maximumf %349, %350 : vector<8x64xf32>
    %c1_200 = arith.constant 1 : index
    %c0_201 = arith.constant 0 : index
    %c0_202 = arith.constant 0 : index
    %352 = vector.load %arg23[%c1_200, %c0_201, %c0_202] : memref<2x64x32xf32, #tpu.memory_space<vmem>>, vector<1x64x32xf32>
    %353 = vector.shape_cast %352 : vector<1x64x32xf32> to vector<64x32xf32>
    %cst_203 = arith.constant dense<0.000000e+00> : vector<8x32xf32>
    %354 = tpu.matmul %351, %353, %cst_203 {dimension_numbers = #tpu.dot_dimension_numbers<[1], [0], [0], [1], [0, 0, 1, 1], [], []>} : vector<8x64xf32>, vector<64x32xf32>, vector<8x32xf32> -> vector<8x32xf32>
    %c1_204 = arith.constant 1 : index
    %c0_205 = arith.constant 0 : index
    %c0_206 = arith.constant 0 : index
    %355 = vector.load %arg24[%c1_204, %c0_205, %c0_206] : memref<2x1x32xf32, #tpu.memory_space<vmem>>, vector<1x1x32xf32>
    %356 = vector.shape_cast %355 : vector<1x1x32xf32> to vector<1x32xf32>
    %357 = vector.broadcast %356 : vector<1x32xf32> to vector<8x32xf32>
    %358 = arith.addf %354, %357 : vector<8x32xf32>
    %359 = arith.addf %317, %358 : vector<8x32xf32>
    %c0_207 = arith.constant 0 : index
    %c0_208 = arith.constant 0 : index
    %360 = vector.load %arg25[%c0_207, %c0_208] : memref<1x32xf32, #tpu.memory_space<vmem>>, vector<1x32xf32>
    %c0_209 = arith.constant 0 : index
    %c0_210 = arith.constant 0 : index
    %361 = vector.load %arg26[%c0_209, %c0_210] : memref<1x32xf32, #tpu.memory_space<vmem>>, vector<1x32xf32>
    %cst_211 = arith.constant dense<0.000000e+00> : vector<8xf32>
    %362 = vector.multi_reduction <add>, %359, %cst_211 [1] : vector<8x32xf32> to vector<8xf32>
    %363 = vector.shape_cast %362 : vector<8xf32> to vector<8x1xf32>
    %cst_212 = arith.constant 3.125000e-02 : f32
    %364 = vector.broadcast %cst_212 : f32 to vector<8x1xf32>
    %365 = arith.mulf %363, %364 : vector<8x1xf32>
    %366 = vector.broadcast %365 : vector<8x1xf32> to vector<8x32xf32>
    %367 = arith.subf %359, %366 : vector<8x32xf32>
    %368 = arith.mulf %367, %367 : vector<8x32xf32>
    %cst_213 = arith.constant dense<0.000000e+00> : vector<8xf32>
    %369 = vector.multi_reduction <add>, %368, %cst_213 [1] : vector<8x32xf32> to vector<8xf32>
    %370 = vector.shape_cast %369 : vector<8xf32> to vector<8x1xf32>
    %cst_214 = arith.constant 0.0322580636 : f32
    %371 = vector.broadcast %cst_214 : f32 to vector<8x1xf32>
    %372 = arith.mulf %370, %371 : vector<8x1xf32>
    %373 = math.sqrt %372 : vector<8x1xf32>
    %cst_215 = arith.constant 9.99999997E-7 : f32
    %374 = vector.broadcast %cst_215 : f32 to vector<8x1xf32>
    %375 = arith.addf %373, %374 : vector<8x1xf32>
    %376 = tpu.reciprocal %375 : vector<8x1xf32> -> vector<8x1xf32>
    %377 = vector.broadcast %376 : vector<8x1xf32> to vector<8x32xf32>
    %378 = arith.mulf %367, %377 : vector<8x32xf32>
    %379 = vector.broadcast %360 : vector<1x32xf32> to vector<8x32xf32>
    %380 = arith.mulf %378, %379 : vector<8x32xf32>
    %381 = vector.broadcast %361 : vector<1x32xf32> to vector<8x32xf32>
    %382 = arith.addf %380, %381 : vector<8x32xf32>
    %c0_216 = arith.constant 0 : index
    %c0_217 = arith.constant 0 : index
    %c0_218 = arith.constant 0 : index
    %383 = vector.load %arg27[%c0_216, %c0_217, %c0_218] : memref<1x8x32xf32, #tpu.memory_space<vmem>>, vector<1x8x32xf32>
    %384 = vector.shape_cast %383 : vector<1x8x32xf32> to vector<8x32xf32>
    %385 = vector.shape_cast %382 : vector<8x32xf32> to vector<1x8x32xf32>
    tpu.vector_store %arg27[%c0_216, %c0_217, %c0_218], %385 {strides = array<i32>} : memref<1x8x32xf32, #tpu.memory_space<vmem>>, vector<1x8x32xf32>,
    return
  }
  func.func @transform_0(%arg0: i32) -> (i32, i32, i32) {
    %c0_i32 = arith.constant 0 : i32
    %c0_i32_0 = arith.constant 0 : i32
    %c0_i32_1 = arith.constant 0 : i32
    return %arg0, %c0_i32, %c0_i32_0 : i32, i32, i32
  }
  func.func @transform_1(%arg0: i32) -> (i32, i32, i32) {
    %c0_i32 = arith.constant 0 : i32
    %c0_i32_0 = arith.constant 0 : i32
    %c0_i32_1 = arith.constant 0 : i32
    return %arg0, %c0_i32, %c0_i32_0 : i32, i32, i32
  }
  func.func @transform_2(%arg0: i32) -> (i32, i32, i32) {
    %c0_i32 = arith.constant 0 : i32
    %c0_i32_0 = arith.constant 0 : i32
    %c0_i32_1 = arith.constant 0 : i32
    return %arg0, %c0_i32, %c0_i32_0 : i32, i32, i32
  }
  func.func @transform_3(%arg0: i32) -> (i32, i32, i32) {
    %c0_i32 = arith.constant 0 : i32
    %c0_i32_0 = arith.constant 0 : i32
    %c0_i32_1 = arith.constant 0 : i32
    return %arg0, %c0_i32, %c0_i32_0 : i32, i32, i32
  }
  func.func @transform_4(%arg0: i32) -> (i32, i32, i32) {
    %c0_i32 = arith.constant 0 : i32
    %c0_i32_0 = arith.constant 0 : i32
    %c0_i32_1 = arith.constant 0 : i32
    %c0_i32_2 = arith.constant 0 : i32
    return %c0_i32, %c0_i32_0, %c0_i32_1 : i32, i32, i32
  }
  func.func @transform_5(%arg0: i32) -> (i32, i32, i32) {
    %c0_i32 = arith.constant 0 : i32
    %c0_i32_0 = arith.constant 0 : i32
    %c0_i32_1 = arith.constant 0 : i32
    %c0_i32_2 = arith.constant 0 : i32
    return %c0_i32, %c0_i32_0, %c0_i32_1 : i32, i32, i32
  }
  func.func @transform_6(%arg0: i32) -> (i32, i32, i32) {
    %c0_i32 = arith.constant 0 : i32
    %c0_i32_0 = arith.constant 0 : i32
    %c0_i32_1 = arith.constant 0 : i32
    %c0_i32_2 = arith.constant 0 : i32
    return %c0_i32, %c0_i32_0, %c0_i32_1 : i32, i32, i32
  }
  func.func @transform_7(%arg0: i32) -> (i32, i32, i32) {
    %c0_i32 = arith.constant 0 : i32
    %c0_i32_0 = arith.constant 0 : i32
    %c0_i32_1 = arith.constant 0 : i32
    %c0_i32_2 = arith.constant 0 : i32
    return %c0_i32, %c0_i32_0, %c0_i32_1 : i32, i32, i32
  }
  func.func @transform_8(%arg0: i32) -> (i32, i32, i32) {
    %c0_i32 = arith.constant 0 : i32
    %c0_i32_0 = arith.constant 0 : i32
    %c0_i32_1 = arith.constant 0 : i32
    %c0_i32_2 = arith.constant 0 : i32
    return %c0_i32, %c0_i32_0, %c0_i32_1 : i32, i32, i32
  }
  func.func @transform_9(%arg0: i32) -> (i32, i32, i32) {
    %c0_i32 = arith.constant 0 : i32
    %c0_i32_0 = arith.constant 0 : i32
    %c0_i32_1 = arith.constant 0 : i32
    %c0_i32_2 = arith.constant 0 : i32
    return %c0_i32, %c0_i32_0, %c0_i32_1 : i32, i32, i32
  }
  func.func @transform_10(%arg0: i32) -> (i32, i32, i32) {
    %c0_i32 = arith.constant 0 : i32
    %c0_i32_0 = arith.constant 0 : i32
    %c0_i32_1 = arith.constant 0 : i32
    %c0_i32_2 = arith.constant 0 : i32
    return %c0_i32, %c0_i32_0, %c0_i32_1 : i32, i32, i32
  }
  func.func @transform_11(%arg0: i32) -> (i32, i32, i32) {
    %c0_i32 = arith.constant 0 : i32
    %c0_i32_0 = arith.constant 0 : i32
    %c0_i32_1 = arith.constant 0 : i32
    %c0_i32_2 = arith.constant 0 : i32
    return %c0_i32, %c0_i32_0, %c0_i32_1 : i32, i32, i32
  }
  func.func @transform_12(%arg0: i32) -> (i32, i32, i32) {
    %c0_i32 = arith.constant 0 : i32
    %c0_i32_0 = arith.constant 0 : i32
    %c0_i32_1 = arith.constant 0 : i32
    %c0_i32_2 = arith.constant 0 : i32
    return %c0_i32, %c0_i32_0, %c0_i32_1 : i32, i32, i32
  }
  func.func @transform_13(%arg0: i32) -> (i32, i32, i32) {
    %c0_i32 = arith.constant 0 : i32
    %c0_i32_0 = arith.constant 0 : i32
    %c0_i32_1 = arith.constant 0 : i32
    %c0_i32_2 = arith.constant 0 : i32
    return %c0_i32, %c0_i32_0, %c0_i32_1 : i32, i32, i32
  }
  func.func @transform_14(%arg0: i32) -> (i32, i32, i32) {
    %c0_i32 = arith.constant 0 : i32
    %c0_i32_0 = arith.constant 0 : i32
    %c0_i32_1 = arith.constant 0 : i32
    %c0_i32_2 = arith.constant 0 : i32
    return %c0_i32, %c0_i32_0, %c0_i32_1 : i32, i32, i32
  }
  func.func @transform_15(%arg0: i32) -> (i32, i32, i32) {
    %c0_i32 = arith.constant 0 : i32
    %c0_i32_0 = arith.constant 0 : i32
    %c0_i32_1 = arith.constant 0 : i32
    %c0_i32_2 = arith.constant 0 : i32
    return %c0_i32, %c0_i32_0, %c0_i32_1 : i32, i32, i32
  }
  func.func @transform_16(%arg0: i32) -> (i32, i32, i32) {
    %c0_i32 = arith.constant 0 : i32
    %c0_i32_0 = arith.constant 0 : i32
    %c0_i32_1 = arith.constant 0 : i32
    %c0_i32_2 = arith.constant 0 : i32
    return %c0_i32, %c0_i32_0, %c0_i32_1 : i32, i32, i32
  }
  func.func @transform_17(%arg0: i32) -> (i32, i32, i32) {
    %c0_i32 = arith.constant 0 : i32
    %c0_i32_0 = arith.constant 0 : i32
    %c0_i32_1 = arith.constant 0 : i32
    %c0_i32_2 = arith.constant 0 : i32
    return %c0_i32, %c0_i32_0, %c0_i32_1 : i32, i32, i32
  }
  func.func @transform_18(%arg0: i32) -> (i32, i32, i32) {
    %c0_i32 = arith.constant 0 : i32
    %c0_i32_0 = arith.constant 0 : i32
    %c0_i32_1 = arith.constant 0 : i32
    %c0_i32_2 = arith.constant 0 : i32
    return %c0_i32, %c0_i32_0, %c0_i32_1 : i32, i32, i32
  }
  func.func @transform_19(%arg0: i32) -> (i32, i32, i32) {
    %c0_i32 = arith.constant 0 : i32
    %c0_i32_0 = arith.constant 0 : i32
    %c0_i32_1 = arith.constant 0 : i32
    %c0_i32_2 = arith.constant 0 : i32
    return %c0_i32, %c0_i32_0, %c0_i32_1 : i32, i32, i32
  }
  func.func @transform_20(%arg0: i32) -> (i32, i32, i32) {
    %c0_i32 = arith.constant 0 : i32
    %c0_i32_0 = arith.constant 0 : i32
    %c0_i32_1 = arith.constant 0 : i32
    %c0_i32_2 = arith.constant 0 : i32
    return %c0_i32, %c0_i32_0, %c0_i32_1 : i32, i32, i32
  }
  func.func @transform_21(%arg0: i32) -> (i32, i32, i32) {
    %c0_i32 = arith.constant 0 : i32
    %c0_i32_0 = arith.constant 0 : i32
    %c0_i32_1 = arith.constant 0 : i32
    %c0_i32_2 = arith.constant 0 : i32
    return %c0_i32, %c0_i32_0, %c0_i32_1 : i32, i32, i32
  }
  func.func @transform_22(%arg0: i32) -> (i32, i32, i32) {
    %c0_i32 = arith.constant 0 : i32
    %c0_i32_0 = arith.constant 0 : i32
    %c0_i32_1 = arith.constant 0 : i32
    %c0_i32_2 = arith.constant 0 : i32
    return %c0_i32, %c0_i32_0, %c0_i32_1 : i32, i32, i32
  }
  func.func @transform_23(%arg0: i32) -> (i32, i32, i32) {
    %c0_i32 = arith.constant 0 : i32
    %c0_i32_0 = arith.constant 0 : i32
    %c0_i32_1 = arith.constant 0 : i32
    %c0_i32_2 = arith.constant 0 : i32
    return %c0_i32, %c0_i32_0, %c0_i32_1 : i32, i32, i32
  }
  func.func @transform_24(%arg0: i32) -> (i32, i32) {
    %c0_i32 = arith.constant 0 : i32
    %c0_i32_0 = arith.constant 0 : i32
    %c0_i32_1 = arith.constant 0 : i32
    return %c0_i32, %c0_i32_0 : i32, i32
  }
  func.func @transform_25(%arg0: i32) -> (i32, i32) {
    %c0_i32 = arith.constant 0 : i32
    %c0_i32_0 = arith.constant 0 : i32
    %c0_i32_1 = arith.constant 0 : i32
    return %c0_i32, %c0_i32_0 : i32, i32
  }
  func.func @transform_26(%arg0: i32) -> (i32, i32, i32) {
    %c0_i32 = arith.constant 0 : i32
    %c0_i32_0 = arith.constant 0 : i32
    %c0_i32_1 = arith.constant 0 : i32
    return %arg0, %c0_i32, %c0_i32_0 : i32, i32, i32
  }
}

</mosaic_0001>

<bundles_post_ra>
// kernel: decoder_forward.1
= control target key start
LH: loop header
LB: loop body
LE: loop exit
PB: predicated region body
PF: predicated region fallthrough
CT: control target
= control target key end

     0   :  { %s5891_s0 = inlined_call_operand.hbm [shape: f32[2,8,32], index: 0, kind: input, shape index: {}]   ;;  %s5892_s1 = inlined_call_operand.hbm [shape: f32[2,8,32], index: 1, kind: input, shape index: {}]   ;;  %s5893_s2 = inlined_call_operand.vmem [shape: f32[2,1,8], index: 2, kind: input, shape index: {}]   ;;  %s5894_s3 = inlined_call_operand.hbm [shape: f32[2,8,8], index: 3, kind: input, shape index: {}]   ;;  %s5895_s4 = inlined_call_operand.vmem [shape: f32[2,1,32], index: 4, kind: input, shape index: {}]   ;;  %s5896_s5 = inlined_call_operand.vmem [shape: f32[2,1,32], index: 5, kind: input, shape index: {}]   ;;  %s5897_s6 = inlined_call_operand.vmem [shape: f32[2,32,96], index: 6, kind: input, shape index: {}]   ;;  %s5898_s7 = inlined_call_operand.vmem [shape: f32[2,1,96], index: 7, kind: input, shape index: {}]   ;;  %s5899_s8 = inlined_call_operand.vmem [shape: f32[2,32,32], index: 8, kind: input, shape index: {}]   ;;  %s5900_s9 = inlined_call_operand.vmem [shape: f32[2,1,32], index: 9, kind: input, shape index: {}]   ;;  %s5901_s10 = inlined_call_operand.hbm [shape: f32[2,1,32], index: 10, kind: input, shape index: {}]   ;;  %s5902_s11 = inlined_call_operand.hbm [shape: f32[2,1,32], index: 11, kind: input, shape index: {}]   ;;  %s5903_s12 = inlined_call_operand.vmem [shape: f32[2,32,32], index: 12, kind: input, shape index: {}]   ;;  %s5904_s13 = inlined_call_operand.hbm [shape: f32[2,1,32], index: 13, kind: input, shape index: {}]   ;;  %s5905_s14 = inlined_call_operand.hbm [shape: f32[2,32,64], index: 14, kind: input, shape index: {}]   ;;  %s5906_s15 = inlined_call_operand.hbm [shape: f32[2,1,64], index: 15, kind: input, shape index: {}]   ;;  %s5907_s16 = inlined_call_operand.hbm [shape: f32[2,32,32], index: 16, kind: input, shape index: {}]   ;;  %s5908_s17 = inlined_call_operand.hbm [shape: f32[2,1,32], index: 17, kind: input, shape index: {}]   ;;  %s5909_s18 = inlined_call_operand.hbm [shape: f32[2,1,32], index: 18, kind: input, shape index: {}]   ;;  %s5910_s19 = inlined_call_operand.hbm [shape: f32[2,1,32], index: 19, kind: input, shape index: {}]   ;;  %s5911_s20 = inlined_call_operand.hbm [shape: f32[2,32,64], index: 20, kind: input, shape index: {}]   ;;  %s5912_s21 = inlined_call_operand.hbm [shape: f32[2,1,64], index: 21, kind: input, shape index: {}]   ;;  %s5913_s22 = inlined_call_operand.vmem [shape: f32[2,64,32], index: 22, kind: input, shape index: {}]   ;;  %s5914_s23 = inlined_call_operand.hbm [shape: f32[2,1,32], index: 23, kind: input, shape index: {}]   ;;  %s5915_s24 = inlined_call_operand.vmem [shape: f32[1,32], index: 24, kind: input, shape index: {}]   ;;  %s5916_s25 = inlined_call_operand.hbm [shape: f32[1,32], index: 25, kind: input, shape index: {}]   ;;  %s5917_s26 = inlined_call_operand.hbm [shape: f32[2,8,32], index: 26, kind: output, shape index: {}]  }
   0x1   :  { %5962 = sst [smem:[#allocation45_spill]] %s5891_s0 }
   0x2   :  { %5963 = sst [smem:[#allocation46_spill]] %s5892_s1 }
   0x3   :  { %5964 = sst [smem:[#allocation47_spill]] %s5893_s2 }
   0x4   :  { %5965 = sst [smem:[#allocation48_spill]] %s5894_s3 }
   0x5   :  { %5966 = sst [smem:[#allocation49_spill]] %s5895_s4 }
   0x6   :  { %5967 = sst [smem:[#allocation50_spill]] %s5896_s5 }
   0x7   :  { %5968 = sst [smem:[#allocation51_spill]] %s5897_s6 }
   0x8   :  { %5969 = sst [smem:[#allocation52_spill]] %s5898_s7 }
   0x9   :  { %5970 = sst [smem:[#allocation53_spill]] %s5899_s8 }
   0xa   :  { %5971 = sst [smem:[#allocation54_spill]] %s5900_s9 }
   0xb   :  { %5972 = sst [smem:[#allocation55_spill]] %s5901_s10 }
   0xc   :  { %5973 = sst [smem:[#allocation56_spill]] %s5902_s11 }
   0xd   :  { %5974 = sst [smem:[#allocation57_spill]] %s5903_s12 }
   0xe   :  { %5975 = sst [smem:[#allocation58_spill]] %s5904_s13 }
   0xf   :  { %5976 = sst [smem:[#allocation59_spill]] %s5905_s14 }
  0x10   :  { %5977 = sst [smem:[#allocation60_spill]] %s5906_s15 }
  0x11   :  { %5978 = sst [smem:[#allocation61_spill]] %s5907_s16 }
  0x12   :  { %5979 = sst [smem:[#allocation62_spill]] %s5908_s17 }
  0x13   :  { %5980 = sst [smem:[#allocation63_spill]] %s5910_s19 }
  0x14   :  { %5981 = sst [smem:[#allocation64_spill]] %s5911_s20 }
  0x15   :  { %5982 = sst [smem:[#allocation65_spill]] %s5912_s21 }
  0x16   :  { %5983 = sst [smem:[#allocation66_spill]] %s5913_s22 }
  0x17   :  { %5984 = sst [smem:[#allocation67_spill]] %s5914_s23 }
  0x18   :  { %5985 = sst [smem:[#allocation68_spill]] %s5915_s24 }
  0x19   :  { %5986 = sst [smem:[#allocation69_spill]] %s5916_s25 }
  0x1a   :  { %5987 = sst [smem:[#allocation70_spill]] %s5917_s26 }
  0x1b   :  { %31 = vsyncpa [#allocation3], 0 }
  0x1c   :  { %33 = vsyncpa [#allocation3 + $0x1], 0 }
  0x1d   :  { %34 = vsyncpa [#allocation6], 0 }
  0x1e   :  { %36 = vsyncpa [#allocation6 + $0x1], 0 }
  0x1f   :  { %37 = vsyncpa [#allocation9], 0 }
  0x20   :  { %38 = vsyncpa [#allocation12], 0 }
  0x21   :  { %39 = vsyncpa [#allocation15], 0 }
  0x22   :  { %40 = vsyncpa [#allocation18], 0 }
  0x23   :  { %41 = vsyncpa [#allocation21], 0 }
  0x24   :  { %42 = vsyncpa [#allocation24], 0 }
  0x25   :  { %43 = vsyncpa [#allocation27], 0 }
  0x26   :  { %44 = vsyncpa [#allocation4], 0 }
  0x27   :  { %46 = vsyncpa [#allocation4 + $0x1], 0  ;;  %s4957_s27 = smov 0   ;;  %s4959_s3 = smov 0  }
  0x28   :  { %s4961_s7 = smov 0   ;;  %s4963_s28 = smov 0  }
  0x29 LB: > { %5988 = sst [smem:[#allocation39_spill]] %s4781_s27  ;;  %s4795_s8 = smov [#allocation8]   ;;  %s4793_s28 = sphi %s4963_s28, %s6066_s28   ;;  %s4789_s7 = sphi %s4961_s7, %s6070_s7   ;;  %s4785_s3 = sphi %s4959_s3, %s6069_s3   ;;  %s4781_s27 = sphi %s4957_s27, %s6068_s27  }
  0x2a   : > { %5989 = sst [smem:[#allocation40_spill]] %s4793_s28  ;;  %s679_s4 = sshll.u32 %s4795_s8, 4  ;;  %s4983_s4 = int_to_ptr.vmem [resolvable:$true] %s679_s4 }
  0x2b   : > { %s4978_s29 = sadd.s32 4294967295, %s4793_s28   ;;  %p3479_p0 = scmp.ge.s32.totalorder %s4793_s28, 1 }
  0x2c   : > { %p5936_p1 = scmp.eq.s32.totalorder %s4978_s29, 0  ;;  %p649_p2 = scmp.lt.s32.totalorder %s4793_s28, 3 }
  0x2d   : > { %s4796_s9 = smov [#allocation11]   ;;  %s4797_s5 = smov [#allocation14]  }
  0x2e   : > { %p4985_p3 = pnand %p3479_p0, %p649_p2  ;;  %s708_s30 = sshll.u32 %s4796_s9, 4  ;;  %s4998_s30 = int_to_ptr.vmem [resolvable:$true] %s708_s30 }
  0x2f   : > { %s734_s10 = sshll.u32 %s4797_s5, 4  ;;  %s5993_s8 = sld [smem:[#allocation55_spill]]  ;;  %s5000_s10 = int_to_ptr.vmem [resolvable:$true] %s734_s10 }
  0x30   : > { %s5990_s0 = scalar_select %p4985_p3, 1, 0 }
  0x31   : > { %p4060_p5 = pneg %p4985_p3 }
  0x32   : > { %5991 = sst [smem:[#allocation41_spill]] %s5990_s0 }
  0x33   : > { %p4994_p6 = pnand %p4060_p5, %p5936_p1 }
  0x35   : > { %s5992_s2 = scalar_select %p4994_p6, 1, 0 }
  0x36   : > { %s4241_s26 = scalar_lea.hbm %s5993_s8, 32  ;;  %p5010_p8 = pneg %p4994_p6 }
  0x37   : > { %p4242_p7 = scmp.ne.s32.totalorder %s5993_s8, %s4241_s26  ;;  %p4248_p11 = scmp.lt.u32.totalorder %s4241_s26, %s5993_s8 }
  0x38   : > { %s5994_s9 = scalar_select %p5010_p8, 1, 0 }
  0x39   : > { %p4244_p9 = pnand %p5010_p8, %p4242_p7 }
  0x3b   : > { %p4245_p10 = pneg %p4244_p9 }
  0x3d   : > { %p4250_p12 = pnand %p4248_p11, %p4245_p10 }
  0x3f   : > { %4253 = shalt.err (!%p4250_p12)
}
  0x40   : > { %s4254_s22 = scalar_lea.vmem %s4983_s4, 32  ;;  %p4262_p5 = scmp.lt.s32.totalorder %s4983_s4, %s4983_s4 }
  0x41   : > { %p4255_p13 = scmp.ne.s32.totalorder %s4983_s4, %s4254_s22  ;;  %p4263_p4 = scmp.lt.s32.totalorder %s4254_s22, %s4254_s22 }
  0x43   : > { %p4257_p0 = pnand %p4255_p13, %p5010_p8  ;;  %p4264_p7 = por %p4263_p4, %p4262_p5 }
  0x45   : > { %p4258_p2 = pneg %p4257_p0 }
  0x47   : > { %p4265_p9 = pnand %p4264_p7, %p4258_p2 }
  0x49   : > { %4268 = shalt.err (!%p4265_p9)
}
  0x4a   : > { %s5938_s24 = smov 16   ;;  %s5941_s12 = smov 1  }
  0x4b   : > { %4063 = dma.hbm_to_vmem [thread:$0]  (!%p4994_p6), %s5993_s8, 32, %s4983_s4, [#allocation9], %s5938_s24, %s5938_s24, %s5941_s12  }
  0x4c   : > { %s5995_s13 = sld [smem:[#allocation58_spill]] }
  0x52   : > { %s4269_s22 = scalar_lea.hbm %s5995_s13, 32 }
  0x53   : > { %p4270_p4 = scmp.ne.s32.totalorder %s5995_s13, %s4269_s22  ;;  %p4276_p12 = scmp.lt.u32.totalorder %s4269_s22, %s5995_s13 }
  0x55   : > { %p4272_p10 = pnand %p4270_p4, %p5010_p8 }
  0x57   : > { %p4273_p11 = pneg %p4272_p10 }
  0x59   : > { %p4278_p13 = pnand %p4276_p12, %p4273_p11 }
  0x5b   : > { %4281 = shalt.err (!%p4278_p13)
}
  0x5c   : > { %s4282_s4 = scalar_lea.vmem %s4998_s30, 32  ;;  %p4290_p7 = scmp.lt.s32.totalorder %s4998_s30, %s4998_s30 }
  0x5d   : > { %p4283_p0 = scmp.ne.s32.totalorder %s4998_s30, %s4282_s4  ;;  %p4291_p9 = scmp.lt.s32.totalorder %s4282_s4, %s4282_s4 }
  0x5f   : > { %p4285_p2 = pnand %p4283_p0, %p5010_p8  ;;  %p4292_p4 = por %p4291_p9, %p4290_p7 }
  0x61   : > { %p4286_p5 = pneg %p4285_p2 }
  0x63   : > { %p4293_p10 = pnand %p4292_p4, %p4286_p5 }
  0x65   : > { %4296 = shalt.err (!%p4293_p10)
}
  0x66   : > { %4069 = dma.hbm_to_vmem [thread:$0]  (!%p4994_p6), %s5995_s13, 32, %s4998_s30, [#allocation12], %s5938_s24, %s5938_s24, %s5941_s12  }
  0x67   : > { %s5996_s15 = sld [smem:[#allocation60_spill]] }
  0x6d   : > { %s4297_s26 = scalar_lea.hbm %s5996_s15, 32 }
  0x6e   : > { %p4298_p11 = scmp.ne.s32.totalorder %s5996_s15, %s4297_s26  ;;  %p4304_p0 = scmp.lt.u32.totalorder %s4297_s26, %s5996_s15 }
  0x70   : > { %p4300_p12 = pnand %p4298_p11, %p5010_p8 }
  0x72   : > { %p4301_p13 = pneg %p4300_p12 }
  0x74   : > { %p4306_p2 = pnand %p4304_p0, %p4301_p13 }
  0x76   : > { %4309 = shalt.err (!%p4306_p2)
}
  0x77   : > { %s4310_s30 = scalar_lea.vmem %s5000_s10, 32  ;;  %p4318_p4 = scmp.lt.s32.totalorder %s5000_s10, %s5000_s10 }
  0x78   : > { %p4311_p5 = scmp.ne.s32.totalorder %s5000_s10, %s4310_s30  ;;  %p4319_p10 = scmp.lt.s32.totalorder %s4310_s30, %s4310_s30 }
  0x7a   : > { %p4313_p7 = pnand %p4311_p5, %p5010_p8  ;;  %p4320_p11 = por %p4319_p10, %p4318_p4 }
  0x7c   : > { %p4314_p9 = pneg %p4313_p7 }
  0x7e   : > { %p4321_p12 = pnand %p4320_p11, %p4314_p9 }
  0x80   : > { %4324 = shalt.err (!%p4321_p12)
}
  0x81   : > { %4075 = dma.hbm_to_vmem [thread:$0]  (!%p4994_p6), %s5996_s15, 32, %s5000_s10, [#allocation15], %s5938_s24, %s5938_s24, %s5941_s12  }
  0x82   : > { %s4800_s23 = smov [#allocation17]   ;;  %s4801_s0 = smov [#allocation20]  }
  0x83   : > { %s760_s25 = sshll.u32 %s4800_s23, 4  ;;  %s786_s26 = sshll.u32 %s4801_s0, 4  ;;  %s761_s25 = int_to_ptr.vmem [resolvable:$true] %s760_s25  ;;  %s787_s26 = int_to_ptr.vmem [resolvable:$true] %s786_s26 }
  0x84   : > { %s5997_s17 = sld [smem:[#allocation62_spill]] }
  0x8a   : > { %s4325_s5 = scalar_lea.hbm %s5997_s17, 32 }
  0x8b   : > { %p4326_p13 = scmp.ne.s32.totalorder %s5997_s17, %s4325_s5  ;;  %p4332_p5 = scmp.lt.u32.totalorder %s4325_s5, %s5997_s17 }
  0x8d   : > { %p4328_p0 = pnand %p4326_p13, %p5010_p8 }
  0x8f   : > { %p4329_p2 = pneg %p4328_p0 }
  0x91   : > { %p4334_p7 = pnand %p4332_p5, %p4329_p2 }
  0x93   : > { %4337 = shalt.err (!%p4334_p7)
}
  0x94   : > { %s4338_s10 = scalar_lea.vmem %s761_s25, 32  ;;  %p4346_p11 = scmp.lt.s32.totalorder %s761_s25, %s761_s25 }
  0x95   : > { %p4339_p9 = scmp.ne.s32.totalorder %s761_s25, %s4338_s10  ;;  %p4347_p12 = scmp.lt.s32.totalorder %s4338_s10, %s4338_s10 }
  0x97   : > { %p4341_p4 = pnand %p4339_p9, %p5010_p8  ;;  %p4348_p1 = por %p4347_p12, %p4346_p11 }
  0x99   : > { %p4342_p10 = pneg %p4341_p4 }
  0x9b   : > { %p4349_p3 = pnand %p4348_p1, %p4342_p10 }
  0x9d   : > { %4352 = shalt.err (!%p4349_p3)
}
  0x9e   : > { %4081 = dma.hbm_to_vmem [thread:$0]  (!%p4994_p6), %s5997_s17, 32, %s761_s25, [#allocation18], %s5938_s24, %s5938_s24, %s5941_s12  }
  0x9f   : > { %s5998_s19 = sld [smem:[#allocation63_spill]] }
  0xa5   : > { %s4353_s6 = scalar_lea.hbm %s5998_s19, 32 }
  0xa6   : > { %p4354_p1 = scmp.ne.s32.totalorder %s5998_s19, %s4353_s6  ;;  %p4360_p0 = scmp.lt.u32.totalorder %s4353_s6, %s5998_s19 }
  0xa8   : > { %p4356_p3 = pnand %p4354_p1, %p5010_p8 }
  0xaa   : > { %p4357_p13 = pneg %p4356_p3 }
  0xac   : > { %p4362_p2 = pnand %p4360_p0, %p4357_p13 }
  0xae   : > { %4365 = shalt.err (!%p4362_p2)
}
  0xaf   : > { %s4366_s4 = scalar_lea.vmem %s787_s26, 32  ;;  %p4374_p4 = scmp.lt.s32.totalorder %s787_s26, %s787_s26 }
  0xb0   : > { %p4367_p5 = scmp.ne.s32.totalorder %s787_s26, %s4366_s4  ;;  %p4375_p10 = scmp.lt.s32.totalorder %s4366_s4, %s4366_s4 }
  0xb2   : > { %p4369_p7 = pnand %p4367_p5, %p5010_p8  ;;  %p4376_p11 = por %p4375_p10, %p4374_p4 }
  0xb4   : > { %p4370_p9 = pneg %p4369_p7 }
  0xb6   : > { %p4377_p12 = pnand %p4376_p11, %p4370_p9 }
  0xb8   : > { %4380 = shalt.err (!%p4377_p12)
}
  0xb9   : > { %4087 = dma.hbm_to_vmem [thread:$0]  (!%p4994_p6), %s5998_s19, 32, %s787_s26, [#allocation21], %s5938_s24, %s5938_s24, %s5941_s12  }
  0xba   : > { %s4802_s8 = smov [#allocation23]   ;;  %s5999_s21 = sld [smem:[#allocation65_spill]] }
  0xbb   : > { %s812_s20 = sshll.u32 %s4802_s8, 4  ;;  %s813_s20 = int_to_ptr.vmem [resolvable:$true] %s812_s20 }
  0xc0   : > { %s4381_s6 = scalar_lea.hbm %s5999_s21, 32 }
  0xc1   : > { %p4382_p1 = scmp.ne.s32.totalorder %s5999_s21, %s4381_s6  ;;  %p4388_p0 = scmp.lt.u32.totalorder %s4381_s6, %s5999_s21 }
  0xc3   : > { %p4384_p3 = pnand %p4382_p1, %p5010_p8 }
  0xc5   : > { %p4385_p13 = pneg %p4384_p3 }
  0xc7   : > { %p4390_p2 = pnand %p4388_p0, %p4385_p13 }
  0xc9   : > { %4393 = shalt.err (!%p4390_p2)
}
  0xca   : > { %s4394_s26 = scalar_lea.vmem %s813_s20, 32  ;;  %p4402_p4 = scmp.lt.s32.totalorder %s813_s20, %s813_s20 }
  0xcb   : > { %p4395_p5 = scmp.ne.s32.totalorder %s813_s20, %s4394_s26  ;;  %p4403_p10 = scmp.lt.s32.totalorder %s4394_s26, %s4394_s26 }
  0xcd   : > { %p4397_p7 = pnand %p4395_p5, %p5010_p8  ;;  %p4404_p11 = por %p4403_p10, %p4402_p4 }
  0xcf   : > { %p4398_p9 = pneg %p4397_p7 }
  0xd1   : > { %p4405_p12 = pnand %p4404_p11, %p4398_p9 }
  0xd3   : > { %4408 = shalt.err (!%p4405_p12)
}
  0xd4   : > { %4093 = dma.hbm_to_vmem [thread:$0]  (!%p4994_p6), %s5999_s21, 32, %s813_s20, [#allocation24], %s5938_s24, %s5938_s24, %s5941_s12  }
  0xd5   : > { %s3478_s10 = sadd.s32 4294967294, %s4793_s28   ;;  %s5151_s8 = sadd.s32 1, %s4793_s28  }
  0xd6   : > { %6000 = sst [smem:[#allocation42_spill]] %s5151_s8  ;;  %s56_s23 = ssub.s32 %s4793_s28, %s5151_s8 }
  0xd7   : > { %s59_s0 = sadd.s32 1, %s4789_s7  ;;  %p57_p1 = scmp.eq.s32.totalorder %s56_s23, 0 }
  0xd8   : > { %p66_p3 = scmp.ne.s32.totalorder %s4789_s7, %s4785_s3  ;;  %p67_p13 = scmp.eq.s32.totalorder %s4793_s28, 0 }
  0xd9   : > { %p72_p0 = scmp.ne.s32.totalorder %s4785_s3, %s4781_s27  ;;  %p6002_p5 = scmp.eq.s32.totalorder %s4978_s29, 0 }
  0xda   : > { %s5162_s6 = scalar_select %p57_p1, %s4789_s7, %s59_s0  }
  0xdb   : > { %p68_p2 = por %p67_p13, %p66_p3  ;;  %p5166_p7 = por %p6002_p5, %p72_p0 }
  0xdc   : > { %6001 = sst [smem:[#allocation43_spill]] %s5162_s6  ;;  %p636_p9 = scmp.eq.s32.totalorder %s4978_s29, 1 }
  0xdd   : > { %s6003_s1 = scalar_select %p5166_p7, 1, 0 }
  0xde   : > { %p642_p4 = scmp.eq.s32.totalorder %s3478_s10, 1  ;;  %p4127_p10 = scmp.lt.s32.totalorder %s4793_s28, 2 }
  0xdf   : > { %s5940_s20 = sand.u32 1, %s4789_s7   ;;  %p5173_p11 = por %p636_p9, %p66_p3 }
  0xe0   : > { %p5177_p12 = por %p642_p4, %p72_p0  ;;  %s5183_s30 = sshll.u32 %s5940_s20, 3 }
  0xe1   : > { %s6004_s5 = scalar_select %p5173_p11, 1, 0 }
  0xe2   : > { %s6005_s22 = scalar_select %p5177_p12, 1, 0 }
  0xe3   : > { %s5186_s26 = sshll.u32 %s4793_s28, 7  ;;  %p5188_p1 = pnand %p4127_p10, %p68_p2 }
  0xe4   : > { %6006 = sst [smem:[#allocation44_spill]] %s6005_s22  ;;  %s874_s25 = sand.u32 1, %s4793_s28  }
  0xe5   : > { %s6007_s4 = scalar_select %p5188_p1, 1, 0 }
  0xe6   : > { %s6008_s0 = sld [smem:[#allocation46_spill]]  ;;  %s878_s20 = scalar_lea.vmem [#allocation5], %s5183_s30 }
  0xe7   : > { %s885_s12 = sshll.u32 %s878_s20, 4  ;;  %s4803_s13 = smov [#allocation10]   ;;  %s5200_s12 = int_to_ptr.vmem [resolvable:$true] %s885_s12 }
  0xe8   : > { %s5202_s15 = sshll.u32 %s4803_s13, 4  ;;  %s5204_s17 = scalar_lea.sflag [#allocation6], %s874_s25  ;;  %s693_s15 = int_to_ptr.vmem [resolvable:$true] %s5202_s15 }
  0xe9   : > { %p5210_p13 = pneg %p5188_p1 }
  0xeb   : > { %s6009_s10 = scalar_select %p5210_p13, 1, 0 }
  0xec   : > { %s5197_s24 = scalar_lea.hbm %s6008_s0, %s5186_s26  ;;  %s4414_s21 = scalar_lea.hbm %s6008_s0, 256 }
  0xed   : > { %s4409_s19 = scalar_lea.hbm %s5197_s24, 128  ;;  %p4415_p5 = scmp.lt.u32.totalorder %s5197_s24, %s6008_s0 }
  0xee   : > { %p4410_p3 = scmp.ne.s32.totalorder %s5197_s24, %s4409_s19  ;;  %p4416_p9 = scmp.lt.u32.totalorder %s4414_s21, %s4409_s19 }
  0xef   : > { %p4418_p10 = scmp.lt.u32.totalorder %s4409_s19, %s5197_s24 }
  0xf0   : > { %p4412_p0 = pnand %p5210_p13, %p4410_p3  ;;  %p4417_p4 = por %p4416_p9, %p4415_p5 }
  0xf2   : > { %p4413_p2 = pneg %p4412_p0  ;;  %p4419_p12 = por %p4418_p10, %p4417_p4 }
  0xf4   : > { %p4420_p11 = pnand %p4419_p12, %p4413_p2 }
  0xf6   : > { %4423 = shalt.err (!%p4420_p11)
}
  0xf7   : > { %s4424_s25 = scalar_lea.vmem %s5200_s12, 128  ;;  %s4804_s23 = smov [#allocation5]  }
  0xf8   : > { %p4425_p3 = scmp.ne.s32.totalorder %s5200_s12, %s4424_s25  ;;  %s4429_s20 = sshll.u32 %s4804_s23, 4  ;;  %s4430_s20 = int_to_ptr.vmem [resolvable:$false] %s4429_s20 }
  0xf9   : > { %s4431_s6 = scalar_lea.vmem %s4430_s20, 256  ;;  %p4432_p6 = scmp.lt.s32.totalorder %s5200_s12, %s4430_s20 }
  0xfa   : > { %p4427_p0 = pnand %p4425_p3, %p5210_p13  ;;  %p4433_p8 = scmp.lt.s32.totalorder %s4431_s6, %s4424_s25 }
  0xfc   : > { %p4428_p7 = pneg %p4427_p0  ;;  %p4434_p5 = por %p4433_p8, %p4432_p6 }
  0xfe   : > { %p4435_p9 = pnand %p4434_p5, %p4428_p7 }
 0x100   : > { %4438 = shalt.err (!%p4435_p9)
}
 0x101   : > { %4106 = dma.hbm_to_vmem [thread:$0]  (!%p5188_p1), %s5197_s24, 128, %s5200_s12, %s5204_s17  }
 0x102   : > { %s6010_s11 = sld [smem:[#allocation56_spill]]  ;;  %p6011_p6 = scmp.ne.s32.totalorder %s5994_s9, 0 }
 0x108   : > { %s4439_s13 = scalar_lea.hbm %s6010_s11, 32 }
 0x109   : > { %p4440_p11 = scmp.ne.s32.totalorder %s6010_s11, %s4439_s13  ;;  %p4446_p12 = scmp.lt.u32.totalorder %s4439_s13, %s6010_s11 }
 0x10b   : > { %p4442_p8 = pnand %p4440_p11, %p6011_p6 }
 0x10d   : > { %p4443_p7 = pneg %p4442_p8 }
 0x10f   : > { %p4448_p2 = pnand %p4446_p12, %p4443_p7 }
 0x111   : > { %4451 = shalt.err (!%p4448_p2)
}
 0x112   : > { %s4452_s6 = scalar_lea.vmem %s693_s15, 32  ;;  %p4460_p0 = scmp.lt.s32.totalorder %s693_s15, %s693_s15 }
 0x113   : > { %p4453_p4 = scmp.ne.s32.totalorder %s693_s15, %s4452_s6  ;;  %p4461_p5 = scmp.lt.s32.totalorder %s4452_s6, %s4452_s6 }
 0x115   : > { %p4455_p10 = pnand %p4453_p4, %p6011_p6  ;;  %p4462_p9 = por %p4461_p5, %p4460_p0 }
 0x117   : > { %p4456_p3 = pneg %p4455_p10 }
 0x119   : > { %p4463_p1 = pnand %p4462_p9, %p4456_p3 }
 0x11b   : > { %4466 = shalt.err (!%p4463_p1)
}
 0x11c   : > { %p6012_p11 = scmp.ne.s32.totalorder %s5992_s2, 0  ;;  %s6013_s24 = smov 1  }
 0x11d   : > { %s6014_s12 = smov 16   ;;  %s4805_s21 = smov [#allocation13]  }
 0x11e   : > { %4066 = dma.hbm_to_vmem [thread:$0]  (!%p6012_p11), %s6010_s11, 32, %s693_s15, [#allocation9], %s6014_s12, %s6014_s12, %s6013_s24  }
 0x11f   : > { %s721_s13 = sshll.u32 %s4805_s21, 4  ;;  %s6015_s14 = sld [smem:[#allocation59_spill]]  ;;  %s722_s13 = int_to_ptr.vmem [resolvable:$true] %s721_s13 }
 0x125   : > { %s4467_s20 = scalar_lea.hbm %s6015_s14, 1024 }
 0x126   : > { %p4468_p1 = scmp.ne.s32.totalorder %s6015_s14, %s4467_s20  ;;  %p4474_p12 = scmp.lt.u32.totalorder %s4467_s20, %s6015_s14 }
 0x128   : > { %p4470_p8 = pnand %p4468_p1, %p6011_p6 }
 0x12a   : > { %p4471_p7 = pneg %p4470_p8 }
 0x12c   : > { %p4476_p2 = pnand %p4474_p12, %p4471_p7 }
 0x12e   : > { %4479 = shalt.err (!%p4476_p2)
}
 0x12f   : > { %s4480_s15 = scalar_lea.vmem %s722_s13, 1024  ;;  %p4488_p0 = scmp.lt.s32.totalorder %s722_s13, %s722_s13 }
 0x130   : > { %p4481_p4 = scmp.ne.s32.totalorder %s722_s13, %s4480_s15  ;;  %p4489_p5 = scmp.lt.s32.totalorder %s4480_s15, %s4480_s15 }
 0x132   : > { %p4483_p10 = pnand %p4481_p4, %p6011_p6  ;;  %p4490_p9 = por %p4489_p5, %p4488_p0 }
 0x134   : > { %p4484_p3 = pneg %p4483_p10 }
 0x136   : > { %p4491_p13 = pnand %p4490_p9, %p4484_p3 }
 0x138   : > { %4494 = shalt.err (!%p4491_p13)
}
 0x139   : > { %s5959_s8 = smov 128   ;;  %s5960_s0 = smov 8  }
 0x13a   : > { %4072 = dma.hbm_to_vmem [thread:$0]  (!%p6012_p11), %s6015_s14, 1024, %s722_s13, [#allocation12], %s5959_s8, %s5959_s8, %s5960_s0  }
 0x13b   : > { %s4808_s19 = smov [#allocation16]   ;;  %s4809_s23 = smov [#allocation19]  }
 0x13c   : > { %s747_s21 = sshll.u32 %s4808_s19, 4  ;;  %s773_s25 = sshll.u32 %s4809_s23, 4  ;;  %s748_s21 = int_to_ptr.vmem [resolvable:$true] %s747_s21  ;;  %s5277_s25 = int_to_ptr.vmem [resolvable:$true] %s773_s25 }
 0x13d   : > { %s6016_s16 = sld [smem:[#allocation61_spill]] }
 0x143   : > { %s4495_s15 = scalar_lea.hbm %s6016_s16, 1024 }
 0x144   : > { %p4496_p13 = scmp.ne.s32.totalorder %s6016_s16, %s4495_s15  ;;  %p4502_p7 = scmp.lt.u32.totalorder %s4495_s15, %s6016_s16 }
 0x146   : > { %p4498_p1 = pnand %p4496_p13, %p6011_p6 }
 0x148   : > { %p4499_p8 = pneg %p4498_p1 }
 0x14a   : > { %p4504_p12 = pnand %p4502_p7, %p4499_p8 }
 0x14c   : > { %4507 = shalt.err (!%p4504_p12)
}
 0x14d   : > { %s4508_s22 = scalar_lea.vmem %s748_s21, 1024  ;;  %p4516_p3 = scmp.lt.s32.totalorder %s748_s21, %s748_s21 }
 0x14e   : > { %p4509_p2 = scmp.ne.s32.totalorder %s748_s21, %s4508_s22  ;;  %p4517_p0 = scmp.lt.s32.totalorder %s4508_s22, %s4508_s22 }
 0x150   : > { %p4511_p4 = pnand %p4509_p2, %p6011_p6  ;;  %p4518_p5 = por %p4517_p0, %p4516_p3 }
 0x152   : > { %p4512_p10 = pneg %p4511_p4 }
 0x154   : > { %p4519_p9 = pnand %p4518_p5, %p4512_p10 }
 0x156   : > { %4522 = shalt.err (!%p4519_p9)
}
 0x157   : > { %4078 = dma.hbm_to_vmem [thread:$0]  (!%p6012_p11), %s6016_s16, 1024, %s748_s21, [#allocation15], %s5959_s8, %s5959_s8, %s5960_s0  }
 0x158   : > { %s4523_s20 = scalar_lea.hbm %s5909_s18, 32 }
 0x159   : > { %p4524_p13 = scmp.ne.s32.totalorder %s5909_s18, %s4523_s20  ;;  %p4530_p7 = scmp.lt.u32.totalorder %s4523_s20, %s5909_s18 }
 0x15b   : > { %p4526_p1 = pnand %p4524_p13, %p6011_p6 }
 0x15d   : > { %p4527_p8 = pneg %p4526_p1 }
 0x15f   : > { %p4532_p12 = pnand %p4530_p7, %p4527_p8 }
 0x161   : > { %4535 = shalt.err (!%p4532_p12)
}
 0x162   : > { %s4536_s21 = scalar_lea.vmem %s5277_s25, 32  ;;  %p4544_p3 = scmp.lt.s32.totalorder %s5277_s25, %s5277_s25 }
 0x163   : > { %p4537_p2 = scmp.ne.s32.totalorder %s5277_s25, %s4536_s21  ;;  %p4545_p0 = scmp.lt.s32.totalorder %s4536_s21, %s4536_s21 }
 0x165   : > { %p4539_p4 = pnand %p4537_p2, %p6011_p6  ;;  %p4546_p5 = por %p4545_p0, %p4544_p3 }
 0x167   : > { %p4540_p10 = pneg %p4539_p4 }
 0x169   : > { %p4547_p9 = pnand %p4546_p5, %p4540_p10 }
 0x16b   : > { %4550 = shalt.err (!%p4547_p9)
}
 0x16c   : > { %4084 = dma.hbm_to_vmem [thread:$0]  (!%p6012_p11), %s5909_s18, 32, %s5277_s25, [#allocation18], %s6014_s12, %s6014_s12, %s6013_s24  }
 0x16d   : > { %s4810_s27 = smov [#allocation22]   ;;  %s4811_s23 = smov [#allocation25]  }
 0x16e   : > { %s799_s19 = sshll.u32 %s4810_s27, 4  ;;  %s828_s20 = sshll.u32 %s4811_s23, 4  ;;  %s800_s19 = int_to_ptr.vmem [resolvable:$true] %s799_s19  ;;  %s5326_s20 = int_to_ptr.vmem [resolvable:$true] %s828_s20 }
 0x16f   : > { %s6017_s28 = sld [smem:[#allocation64_spill]] }
 0x175   : > { %s6018_s13 = smov %s6017_s28  ;;  %s4551_s21 = scalar_lea.hbm %s6017_s28, 1024 }
 0x176   : > { %p4552_p13 = scmp.ne.s32.totalorder %s6018_s13, %s4551_s21  ;;  %p4558_p7 = scmp.lt.u32.totalorder %s4551_s21, %s6018_s13 }
 0x178   : > { %p4554_p1 = pnand %p4552_p13, %p6011_p6 }
 0x17a   : > { %p4555_p8 = pneg %p4554_p1 }
 0x17c   : > { %p4560_p12 = pnand %p4558_p7, %p4555_p8 }
 0x17e   : > { %4563 = shalt.err (!%p4560_p12)
}
 0x17f   : > { %s4564_s11 = scalar_lea.vmem %s800_s19, 1024  ;;  %p4572_p3 = scmp.lt.s32.totalorder %s800_s19, %s800_s19 }
 0x180   : > { %p4565_p2 = scmp.ne.s32.totalorder %s800_s19, %s4564_s11  ;;  %p4573_p0 = scmp.lt.s32.totalorder %s4564_s11, %s4564_s11 }
 0x182   : > { %p4567_p4 = pnand %p4565_p2, %p6011_p6  ;;  %p4574_p5 = por %p4573_p0, %p4572_p3 }
 0x184   : > { %p4568_p10 = pneg %p4567_p4 }
 0x186   : > { %p4575_p9 = pnand %p4574_p5, %p4568_p10 }
 0x188   : > { %4578 = shalt.err (!%p4575_p9)
}
 0x189   : > { %s6019_s8 = smov 8   ;;  %s6020_s0 = smov 128  }
 0x18a   : > { %4090 = dma.hbm_to_vmem [thread:$0]  (!%p6012_p11), %s6018_s13, 1024, %s800_s19, [#allocation21], %s6020_s0, %s6020_s0, %s6019_s8  }
 0x18b   : > { %s6021_s28 = sld [smem:[#allocation67_spill]] }
 0x191   : > { %s6022_s21 = smov %s6021_s28  ;;  %s4579_s22 = scalar_lea.hbm %s6021_s28, 32 }
 0x192   : > { %p4580_p13 = scmp.ne.s32.totalorder %s6022_s21, %s4579_s22  ;;  %p4586_p7 = scmp.lt.u32.totalorder %s4579_s22, %s6022_s21 }
 0x194   : > { %p4582_p1 = pnand %p4580_p13, %p6011_p6 }
 0x196   : > { %p4583_p8 = pneg %p4582_p1 }
 0x198   : > { %p4588_p12 = pnand %p4586_p7, %p4583_p8 }
 0x19a   : > { %4591 = shalt.err (!%p4588_p12)
}
 0x19b   : > { %s4592_s19 = scalar_lea.vmem %s5326_s20, 32  ;;  %p4600_p3 = scmp.lt.s32.totalorder %s5326_s20, %s5326_s20 }
 0x19c   : > { %p4593_p2 = scmp.ne.s32.totalorder %s5326_s20, %s4592_s19  ;;  %p4601_p0 = scmp.lt.s32.totalorder %s4592_s19, %s4592_s19 }
 0x19e   : > { %p4595_p4 = pnand %p4593_p2, %p6011_p6  ;;  %p4602_p5 = por %p4601_p0, %p4600_p3 }
 0x1a0   : > { %p4596_p10 = pneg %p4595_p4 }
 0x1a2   : > { %p4603_p9 = pnand %p4602_p5, %p4596_p10 }
 0x1a4   : > { %4606 = shalt.err (!%p4603_p9)
}
 0x1a5   : > { %4096 = dma.hbm_to_vmem [thread:$0]  (!%p6012_p11), %s6022_s21, 32, %s5326_s20, [#allocation24], %s6014_s12, %s6014_s12, %s6013_s24  }
 0x1a6   : > { %s4812_s8 = smov [#allocation26]   ;;  %s6023_s6 = sld [smem:[#allocation45_spill]] }
 0x1a7   : > { %s845_s0 = sshll.u32 %s4812_s8, 4  ;;  %s6024_s25 = sld [smem:[#allocation69_spill]]  ;;  %s846_s0 = int_to_ptr.vmem [resolvable:$true] %s845_s0 }
 0x1ac   : > { %s5379_s15 = scalar_lea.hbm %s6023_s6, %s5186_s26 }
 0x1ad   : > { %s4607_s11 = scalar_lea.hbm %s6024_s25, 16 }
 0x1ae   : > { %p4608_p13 = scmp.ne.s32.totalorder %s6024_s25, %s4607_s11  ;;  %p4614_p7 = scmp.lt.u32.totalorder %s4607_s11, %s6024_s25 }
 0x1b0   : > { %p4610_p1 = pnand %p4608_p13, %p6011_p6 }
 0x1b2   : > { %p4611_p8 = pneg %p4610_p1 }
 0x1b4   : > { %p4616_p12 = pnand %p4614_p7, %p4611_p8 }
 0x1b6   : > { %4619 = shalt.err (!%p4616_p12)
}
 0x1b7   : > { %s4620_s20 = scalar_lea.vmem %s846_s0, 16  ;;  %s4627_s14 = scalar_lea.vmem %s846_s0, 32 }
 0x1b8   : > { %p4621_p2 = scmp.ne.s32.totalorder %s846_s0, %s4620_s20  ;;  %p4628_p3 = scmp.lt.s32.totalorder %s846_s0, %s846_s0 }
 0x1b9   : > { %p4629_p0 = scmp.lt.s32.totalorder %s4627_s14, %s4620_s20 }
 0x1ba   : > { %p4623_p4 = pnand %p4621_p2, %p6011_p6 }
 0x1bb   : > { %p4630_p5 = por %p4629_p0, %p4628_p3 }
 0x1bc   : > { %p4624_p10 = pneg %p4623_p4 }
 0x1be   : > { %p4631_p9 = pnand %p4630_p5, %p4624_p10 }
 0x1c0   : > { %4634 = shalt.err (!%p4631_p9)
}
 0x1c1   : > { %4099 = dma.hbm_to_vmem [thread:$0]  (!%p6012_p11), %s6024_s25, 16, %s846_s0, [#allocation27]  }
 0x1c2   : > { %s860_s9 = scalar_lea.vmem [#allocation2], %s5183_s30  ;;  %s6025_s28 = sld [smem:[#allocation48_spill]] }
 0x1c3   : > { %s867_s8 = sshll.u32 %s860_s9, 4  ;;  %s6027_s11 = sand.u32 1, %s4789_s7   ;;  %s5400_s8 = int_to_ptr.vmem [resolvable:$true] %s867_s8 }
 0x1c4   : > { %s857_s19 = scalar_lea.sflag [#allocation3], %s6027_s11  ;;  %s4635_s24 = scalar_lea.hbm %s5379_s15, 128 }
 0x1c5   : > { %p4636_p6 = scmp.ne.s32.totalorder %s5379_s15, %s4635_s24  ;;  %p6028_p13 = scmp.ne.s32.totalorder %s6009_s10, 0 }
 0x1c6   : > { %s4640_s0 = scalar_lea.hbm %s6023_s6, 256  ;;  %p4641_p11 = scmp.lt.u32.totalorder %s5379_s15, %s6023_s6 }
 0x1c7   : > { %p4638_p1 = pnand %p4636_p6, %p6028_p13  ;;  %p4642_p7 = scmp.lt.u32.totalorder %s4640_s0, %s4635_s24 }
 0x1c8   : > { %s6026_s22 = smov %s6025_s28  ;;  %s5406_s2 = scalar_lea.hbm %s6025_s28, %s5186_s26 }
 0x1c9   : > { %p4639_p8 = pneg %p4638_p1  ;;  %p4643_p12 = por %p4642_p7, %p4641_p11 }
 0x1ca   : > { %p4644_p2 = scmp.lt.u32.totalorder %s4635_s24, %s5379_s15 }
 0x1cc   : > { %p4645_p4 = por %p4644_p2, %p4643_p12 }
 0x1ce   : > { %p4646_p10 = pnand %p4645_p4, %p4639_p8 }
 0x1d0   : > { %4649 = shalt.err (!%p4646_p10)
}
 0x1d1   : > { %s4650_s26 = scalar_lea.vmem %s5400_s8, 128  ;;  %s4813_s16 = smov [#allocation2]  }
 0x1d2   : > { %p4651_p3 = scmp.ne.s32.totalorder %s5400_s8, %s4650_s26  ;;  %s4655_s9 = sshll.u32 %s4813_s16, 4  ;;  %s4656_s9 = int_to_ptr.vmem [resolvable:$false] %s4655_s9 }
 0x1d3   : > { %s4657_s27 = scalar_lea.vmem %s4656_s9, 256  ;;  %p4658_p9 = scmp.lt.s32.totalorder %s5400_s8, %s4656_s9 }
 0x1d4   : > { %p4653_p0 = pnand %p4651_p3, %p6028_p13  ;;  %p4659_p6 = scmp.lt.s32.totalorder %s4657_s27, %s4650_s26 }
 0x1d6   : > { %p4654_p5 = pneg %p4653_p0  ;;  %p4660_p1 = por %p4659_p6, %p4658_p9 }
 0x1d8   : > { %p4661_p11 = pnand %p4660_p1, %p4654_p5 }
 0x1da   : > { %4664 = shalt.err (!%p4661_p11)
}
 0x1db   : > { %p6029_p8 = scmp.ne.s32.totalorder %s6007_s4, 0  ;;  %s902_s23 = scalar_lea.vmem [#allocation7], %s5183_s30 }
 0x1dc   : > { %s909_s28 = sshll.u32 %s902_s23, 4  ;;  %s4665_s11 = scalar_lea.hbm %s5406_s2, 128  ;;  %s910_s28 = int_to_ptr.vmem [resolvable:$true] %s909_s28 }
 0x1dd   : > { %4103 = dma.hbm_to_vmem [thread:$0]  (!%p6029_p8), %s5379_s15, 128, %s5400_s8, %s857_s19  }
 0x1de   : > { %p4666_p7 = scmp.ne.s32.totalorder %s5406_s2, %s4665_s11  ;;  %s4670_s20 = scalar_lea.hbm %s6026_s22, 256 }
 0x1df   : > { %p4671_p4 = scmp.lt.u32.totalorder %s5406_s2, %s6026_s22  ;;  %p4672_p10 = scmp.lt.u32.totalorder %s4670_s20, %s4665_s11 }
 0x1e0   : > { %p4668_p12 = pnand %p4666_p7, %p6028_p13  ;;  %p4674_p0 = scmp.lt.u32.totalorder %s4665_s11, %s5406_s2 }
 0x1e1   : > { %p4673_p3 = por %p4672_p10, %p4671_p4 }
 0x1e2   : > { %p4669_p2 = pneg %p4668_p12 }
 0x1e3   : > { %p4675_p5 = por %p4674_p0, %p4673_p3 }
 0x1e5   : > { %p4676_p9 = pnand %p4675_p5, %p4669_p2 }
 0x1e7   : > { %4679 = shalt.err (!%p4676_p9)
}
 0x1e8   : > { %s4680_s30 = scalar_lea.vmem %s910_s28, 128  ;;  %s4814_s15 = smov [#allocation7]  }
 0x1e9   : > { %p4681_p6 = scmp.ne.s32.totalorder %s910_s28, %s4680_s30  ;;  %s4685_s8 = sshll.u32 %s4814_s15, 4  ;;  %s4686_s8 = int_to_ptr.vmem [resolvable:$false] %s4685_s8 }
 0x1ea   : > { %s4687_s19 = scalar_lea.vmem %s4686_s8, 256  ;;  %p4688_p7 = scmp.lt.s32.totalorder %s910_s28, %s4686_s8 }
 0x1eb   : > { %p4683_p1 = pnand %p4681_p6, %p6028_p13  ;;  %p4689_p12 = scmp.lt.s32.totalorder %s4687_s19, %s4680_s30 }
 0x1ed   : > { %p4684_p11 = pneg %p4683_p1  ;;  %p4690_p8 = por %p4689_p12, %p4688_p7 }
 0x1ef   : > { %p4691_p4 = pnand %p4690_p8, %p4684_p11 }
 0x1f1   : > { %4694 = shalt.err (!%p4691_p4)
}
 0x1f2   : > { %p6030_p10 = scmp.ne.s32.totalorder %s6007_s4, 0  ;;  %s6031_s13 = sld [smem:[#allocation41_spill]] }
 0x1f4   : > { %4109 = dma.hbm_to_vmem [thread:$0]  (!%p6030_p10), %s5406_s2, 128, %s910_s28, %s5204_s17  }
 0x1f8   : > { %p6032_p2 = scmp.ne.s32.totalorder %s6031_s13, 0 }
 0x1f9   : > { %s5453_s10 = sand.u32 (!%p6032_p2), 1, %s4785_s3   ;;  %p6033_p13 = scmp.ne.s32.totalorder (!%p6032_p2), %s6003_s1, 0 }
 0x1fa   : > { %918 = sbr.rel (%p6032_p2) target bundleno = 8634 (0x21ba), region = 124  ;;  %s5456_s26 = sshll.u32 (!%p6032_p2), %s5453_s10, 3 }
 0x1fb   : > { %s921_s16 = scalar_lea.sflag (!%p6032_p2), [#allocation3], %s5453_s10  ;;  %s924_s9 = scalar_lea.vmem (!%p6032_p2), [#allocation2], %s5456_s26 }
 0x201   : > { %4740 = dma.done.wait (%p6033_p13), %s921_s16, 128  }
 0x202   : > { %4742 = vsyncadd (%p6033_p13), %s921_s16, 4294967168  ;;  %s929_s17 = sand.u32 1, %s4978_s29   ;;  %s933_s2 = scalar_lea.vmem [#allocation5], %s5456_s26 }
 0x203   : > { %s930_s4 = scalar_lea.sflag [#allocation6], %s929_s17 }
 0x204   : > { %4744 = dma.done.wait (%p6033_p13), %s930_s4, 256  }
 0x205   : > { %4746 = vsyncadd (%p6033_p13), %s930_s4, 4294967040  ;;  %s942_s27 = scalar_lea.vmem [#allocation7], %s5456_s26  ;;  %p6034_p8 = scmp.eq.s32.totalorder %s4978_s29, 0 }
 0x207   : > { %4748 = dma.done.wait (%p6034_p8), [#allocation9], 64   ;;  %p6035_p3 = pmov %p6034_p8 }
 0x209   : > { %4750 = vsyncadd (%p6035_p3), [#allocation9], 4294967232  ;;  %p6036_p0 = pmov %p6035_p3 }
 0x20b   : > { %4752 = dma.done.wait (%p6036_p0), [#allocation12], 1056   ;;  %p6037_p5 = pmov %p6036_p0 }
 0x20c   : > { %p6038_p9 = pmov %p6036_p0 }
 0x20d   : > { %4754 = vsyncadd (%p6037_p5), [#allocation12], 4294966240 }
 0x20e   : > { %4756 = dma.done.wait (%p6038_p9), [#allocation15], 1056   ;;  %p6039_p6 = pmov %p6036_p0 }
 0x20f   : > { %p6040_p1 = pmov %p6036_p0 }
 0x210   : > { %4758 = vsyncadd (%p6039_p6), [#allocation15], 4294966240 }
 0x211   : > { %4760 = dma.done.wait (%p6040_p1), [#allocation18], 64   ;;  %p6041_p11 = pmov %p6036_p0 }
 0x212   : > { %p6042_p7 = pmov %p6036_p0 }
 0x213   : > { %4762 = vsyncadd (%p6041_p11), [#allocation18], 4294967232 }
 0x214   : > { %4764 = dma.done.wait (%p6042_p7), [#allocation21], 1056   ;;  %p6043_p12 = pmov %p6036_p0 }
 0x215   : > { %p6044_p4 = pmov %p6036_p0 }
 0x216   : > { %4766 = vsyncadd (%p6043_p12), [#allocation21], 4294966240 }
 0x217   : > { %4768 = dma.done.wait (%p6044_p4), [#allocation24], 64   ;;  %p6045_p10 = pmov %p6036_p0 }
 0x218   : > { %p6046_p2 = pmov %p6036_p0 }
 0x219   : > { %4770 = vsyncadd (%p6045_p10), [#allocation24], 4294967232 }
 0x21a   : > { %4772 = dma.done.wait (%p6046_p2), [#allocation27], 16   ;;  %p6047_p13 = pmov %p6036_p0 }
 0x21b   : > { %vm1085_vm0 = vcmask 261120   ;;  %v5499_v0 = vld [vmem:[%s924_s9] sm:$0xff]  ;;  %s6048_s28 = sld [smem:[#allocation51_spill]]  ;;  %v4815_v10 = vmov 0.0|0.0   ;;  %vm4816_vm1 = vmmov 0   ;;  %v4817_v13 = vmov 0.0  }
 0x21c   : > { %4774 = vsyncadd (%p6047_p13), [#allocation27], 4294967280  ;;  %v1086_v1 = vsel %vm1085_vm0, %v5499_v0, 0.0  ;;  %3904 = vmatprep.subr.bf16.mxu1 %v4815_v10  ;;  %3702 = vmatprep.mubr.msk.f32.mxu1 %vm4816_vm1, %v4817_v13  ;;  %s6050_s19 = sld [smem:[#allocation49_spill]]  ;;  %s6051_s9 = sld [smem:[#allocation50_spill]]  ;;  %v5545_v34 = vld [vmem:[%s942_s27] sm:$0xff] }
 0x21d   : > { %1087 = vadd.xlane.f32.xlu0 %v1086_v1  ;;  %3910 = vmatprep.subr.bf16.mxu0 %v4815_v10  ;;  %s6052_s1 = sld [smem:[#allocation52_spill]]  ;;  %s4818_s23 = smov 96   ;;  %vm1282_vm4 = vcmp.eq.f32.partialorder %v5545_v34, 0.0  ;;  %vm1284_vm5 = vcmask 64512   ;;  %vm2054_vm12 = vcmask 523264  }
 0x21e   : > { %3723 = vmatprep.mubr.msk.f32.mxu0 %vm4816_vm1, %v4817_v13  ;;  %s4819_s27 = smov 64   ;;  %s6053_s12 = sld [smem:[#allocation53_spill]] }
 0x21f   : > { %s6054_s17 = sld [smem:[#allocation54_spill]]  ;;  %s6055_s24 = sld [smem:[#allocation57_spill]] }
 0x220   : > { %p1076_p8 = scmp.lt.s32.totalorder %s4978_s29, 1  ;;  %s6056_s4 = sld [smem:[#allocation47_spill]] }
 0x221   : > { %s6049_s11 = smov %s6048_s28  ;;  %v1120_v7 = vld [vmem:[%s6048_s28] sm:$0xff]  ;;  %s6057_s14 = sld [smem:[#allocation66_spill]] }
 0x222   : > { %v1121_v8 = vld [vmem:[%s6049_s11 + $0x8] sm:$0xff]  ;;  %v1122_v9 = vld [vmem:[%s6049_s11 + $0x10] sm:$0xff]  ;;  %v1123_v12 = vld [vmem:[%s6049_s11 + $0x18] sm:$0xff]  ;;  %s6058_s0 = sld [smem:[#allocation68_spill]]  ;;  %s3597_s30 = sshll.u32 %s4978_s29, 7 }
 0x223   : > { %v3905_v11 = vpack.c.bf16 %v1121_v8, %v1120_v7  ;;  %v3908_v14 = vpack.c.bf16 %v1123_v12, %v1122_v9  ;;  %v3518_v24 = vld [vmem:[%s6050_s19] ss:$0 sm:$0xff]  ;;  %v1579_v9 = vld [vmem:[#allocation13 + $0x10] sm:$0xff]  ;;  %s1075_s15 = scalar_lea.vmem [#allocation28], %s5456_s26  ;;  %p6060_p0 = scmp.ne.s32.totalorder %s6004_s5, 0 }
 0x224   : > { %v3519_v26 = vld [vmem:[%s6051_s9] ss:$0 sm:$0xff]  ;;  %v1373_v46 = vld [vmem:[%s6053_s12 + $0x8] sm:$0xff]  ;;  %v1374_v47 = vld [vmem:[%s6053_s12 + $0x10] sm:$0xff]  ;;  %s3232_s8 = sshll.u32 %s1075_s15, 4  ;;  %s5848_s8 = int_to_ptr.vmem [resolvable:$true] %s3232_s8 }
 0x225   : > { %3906 = vmatpush3.bf16.msra.mxu1 %v3905_v11  ;;  %v3520_v29 = vld [vmem:[%s6052_s1] ss:$0 sm:$0xff]  ;;  %v1375_v49 = vld [vmem:[%s6053_s12 + $0x18] sm:$0xff]  ;;  %v1494_v8 = vld [vmem:[%s6055_s24 + $0x8] sm:$0xff] }
 0x226   : > { %3907 = vmatprep.subr.bf16.mxu1 %v4815_v10  ;;  %v1372_v45 = vld [vmem:[%s6053_s12] sm:$0xff]  ;;  %v3914_v50 = vpack.c.bf16 %v1375_v49, %v1374_v47  ;;  %v1580_v11 = vld [vmem:[#allocation13 + $0x18] sm:$0xff] }
 0x227   : > { %v3911_v48 = vpack.c.bf16 %v1373_v46, %v1372_v45  ;;  %v3525_v57 = vld [vmem:[%s6054_s17] ss:$0 sm:$0xff]  ;;  %v4820_v46 = vmov 0   ;;  %v3559_v34 = vld [vmem:[%s6053_s12 + $0x28] sm:$0xff] }
 0x229   : > { %3909 = vmatpush3.bf16.msra.mxu1 %v3908_v14  ;;  %3912 = vmatpush3.bf16.msra.mxu0 %v3911_v48  ;;  %v1495_v14 = vld [vmem:[%s6055_s24 + $0x10] sm:$0xff] }
 0x22a   : > { %3705 = vmatprep.subr.mxu1 %v4817_v13  ;;  %3913 = vmatprep.subr.bf16.mxu0 %v4815_v10 }
 0x22d   : > { %3915 = vmatpush3.bf16.msra.mxu0 %v3914_v50 }
 0x22e   : > { %3922 = vmatprep.subr.bf16.mxu0 %v4815_v10 }
 0x2aa   : > { %v1088_v2 = vpop.xlane.xlu0 %1087 }
 0x2ab   : > { %v1089_v3 = vmul.f32 0.03125, %v1088_v2 }
 0x2ad   : > { %v1090_v4 = vsub.f32 %v5499_v0, %v1089_v3 }
 0x2af   : > { %v1091_v5 = vmul.f32 %v1090_v4, %v1090_v4 }
 0x2b1   : > { %v1092_v6 = vsel %vm1085_vm0, %v1091_v5, 0.0  ;;  %v1577_v5 = vld [vmem:[#allocation13] sm:$0xff] }
 0x2b2   : > { %1093 = vadd.xlane.f32.xlu0 %v1092_v6  ;;  %v1578_v6 = vld [vmem:[#allocation13 + $0x8] sm:$0xff] }
 0x2b3   : > { %v3923_v7 = vpack.c.bf16 %v1578_v6, %v1577_v5 }
 0x33f   : > { %v1094_v15 = vpop.xlane.xlu0 %1093 }
 0x340   : > { %v1095_v16 = vmul.f32 0.032258064, %v1094_v15  ;;  %v1496_v15 = vld [vmem:[%s6055_s24 + $0x18] sm:$0xff] }
 0x342   : > { %4197 = vrsqrt.f32 %v1095_v16  ;;  %vm1098_vm2 = vcmp.eq.f32.partialorder %v1095_v16, inf  ;;  %v1101_v19 = vand.u32 2147483648, %v1095_v16  ;;  %vm1100_vm3 = vcmp.eq.f32.partialorder %v1095_v16, 0.0 }
 0x34c   : > { %v4198_v17 = vpop.eup %4197 }
 0x34d   : > { %v1097_v18 = vmul.f32 %v4198_v17, %v1095_v16  ;;  %v3920_v17 = vpack.c.bf16 %v1496_v15, %v1495_v14 }
 0x34f   : > { %v1099_v20 = vsel %vm1098_vm2, %v1095_v16, %v1097_v18  ;;  %v3926_v16 = vpack.c.bf16 %v1580_v11, %v1579_v9  ;;  %v5600_v18 = vld [vmem:[%s933_s2] sm:$0xff]  ;;  %s1077_s2 = scalar_select %p1076_p8, %s4978_s29, 1 }
 0x350   : > { %v1102_v21 = vsel %vm1100_vm3, %v1101_v19, %v1099_v20  ;;  %s4821_s29 = smov [#allocation28]  }
 0x351   : > { %v1103_v22 = vadd.f32 1e-06, %v1102_v21  ;;  %s1078_s28 = scalar_lea.vmem %s6056_s4, %s1077_s2  ;;  %s4695_s4 = scalar_lea.vmem %s5848_s8, 128 }
 0x352   : > { %p4696_p3 = scmp.ne.s32.totalorder %s5848_s8, %s4695_s4  ;;  %s4699_s26 = sshll.u32 %s4821_s29, 4  ;;  %s4700_s26 = int_to_ptr.vmem [resolvable:$false] %s4699_s26 }
 0x353   : > { %4199 = vrcp.f32 %v1103_v22  ;;  %p4702_p6 = scmp.lt.s32.totalorder %s5848_s8, %s4700_s26 }
 0x354   : > { %p4697_p5 = pnand %p4696_p3, %p6060_p0 }
 0x356   : > { %p4698_p9 = pneg %p4697_p5 }
 0x35d   : > { %v4200_v23 = vpop.eup %4199 }
 0x35e   : > { %v1105_v25 = vmul.f32 %v4200_v23, %v1090_v4 }
 0x360   : > { %v1112_v27 = vmul.f32 %v3518_v24, %v1105_v25 }
 0x362   : > { %v1119_v28 = vadd.f32 %v3519_v26, %v1112_v27 }
 0x364   : > { %3703 = vmatmul.mubr.msk.f32.vlgmr.msra.gmra.mrb[0].mxu1 %vm1085_vm0, %v1119_v28  ;;  %v3527_v28 = vld [vmem:[#allocation8] ss:$0 sm:$0xff] }
 0x365   : > { %3707 = vmatprep.mubr.msk.f32.mxu1 %vm4816_vm1, %v4817_v13 }
 0x437   : > { %v1200_v30 = vpop.f32.mrb[0].mxu1 }
 0x438   : > { %v1201_v31 = vadd.f32 %v3520_v29, %v1200_v30  ;;  %v3704_v32 = vpop.f32.mrb[1].mxu1  ;;  %v3528_v30 = vld [vmem:[#allocation10] ss:$0 sm:$0xff] }
 0x43a   : > { %1205 = vrot.lane.b32.xlu1 %v1201_v31, %s4818_s23 }
 0x4ac   : > { %v1206_v33 = vpop.permute.xlu1 %1205 }
 0x4ad   : > { %3706 = vmatpush3.xpose.msk.msra.mxu1 %vm1085_vm0, %v1206_v33  ;;  %v3531_v33 = vld [vmem:[#allocation14] ss:$0 sm:$0xff] }
 0x4ae   : > { %3710 = vmatprep.subr.mxu1 %v4817_v13 }
 0x4b0   : > { %3708 = vmatmul.mubr.msk.f32.vlgmr.msra.gmra.mrb[2].mxu1 %vm1085_vm0, %v1201_v31 }
 0x4b1   : > { %3712 = vmatprep.mubr.msk.f32.mxu1 %vm4816_vm1, %v4817_v13 }
 0x583   : > { %v1277_v35 = vpop.f32.mrb[2].mxu1 }
 0x584   : > { %v1281_v36 = vmul.f32 0.17677669, %v1277_v35  ;;  %v3709_v37 = vpop.f32.mrb[3].mxu1 }
 0x586   : > { %v1283_v38 = vsel %vm1282_vm4, -1e+09, %v1281_v36 }
 0x587   : > { %v1285_v39 = vsel %vm1284_vm5, %v1283_v38, -inf }
 0x588   : > { %1286 = vmax.xlane.f32.xlu1 %v1285_v39 }
 0x615   : > { %v1287_v40 = vpop.xlane.xlu1 %1286 }
 0x616   : > { %v1288_v41 = vsub.f32 %v1283_v38, %v1287_v40  ;;  %v3529_v38 = vld [vmem:[#allocation11] ss:$0 sm:$0xff] }
 0x618   : > { %v1289_v42 = vmul.f32 1.442695, %v1288_v41 }
 0x61a   : > { %4201 = vpow2.f32 %v1289_v42  ;;  %v1740_v42 = vlaneseq }
 0x624   : > { %v4202_v43 = vpop.eup %4201 }
 0x625   : > { %v1291_v44 = vsel %vm1284_vm5, %v4202_v43, 0.0 }
 0x626   : > { %1292 = vadd.xlane.f32.xlu0 %v1291_v44  ;;  %v1741_v44 = vshrl.u32 %v1740_v42, 7 }
 0x628   : > { %v1742_v45 = vsub.s32 0, %v1741_v44 }
 0x63c   : > { %1296 = vrot.lane.b32.xlu0 %v1201_v31, %s4819_s27 }
 0x6b3   : > { %v1293_v51 = vpop.xlane.xlu0 %1292 }
 0x6b4   : > { %4203 = vrcp.f32 %v1293_v51 }
 0x6b7   : > { %v1297_v52 = vpop.permute.xlu0 %1296 }
 0x6b8   : > { %3711 = vmatpush3.msra.mxu1 %v1297_v52 }
 0x6b9   : > { %3916 = vmatprep.subr.bf16.mxu1 %v4815_v10 }
 0x6be   : > { %v4204_v53 = vpop.eup %4203 }
 0x6bf   : > { %v1295_v54 = vmul.f32 %v4204_v53, %v4202_v43  ;;  %v1081_v43 = vld [vmem:[%s1078_s28] sm:$0x1]  ;;  %s4701_s28 = scalar_lea.vmem %s4700_s26, 256 }
 0x6c0   : > { %vm1738_vm8 = vcmp.eq.f32.partialorder %v1081_v43, 0.0  ;;  %p4703_p1 = scmp.lt.s32.totalorder %s4701_s28, %s4695_s4 }
 0x6c1   : > { %3713 = vmatmul.mubr.msk.f32.vlgmr.msra.gmra.mrb[4].mxu1 %vm1284_vm5, %v1295_v54  ;;  %v1739_v47 = vsel %vm1738_vm8, 1, %v4820_v46  ;;  %v3538_v46 = vld [vmem:[#allocation19] ss:$0 sm:$0xff] }
 0x6c2   : > { %3734 = vmatprep.mubr.msk.f32.mxu1 %vm4816_vm1, %v4817_v13  ;;  %v5621_v48 = vrot.slane %v1739_v47, %v1742_v45  ;;  %p4704_p11 = por %p4703_p1, %p4702_p6 }
 0x6c4   : > { %vm1744_vm9 = vcmp.eq.s32.totalorder %v5621_v48, 1  ;;  %p4705_p7 = pnand %p4704_p11, %p4698_p9 }
 0x794   : > { %v1368_v55 = vpop.f32.mrb[4].mxu1 }
 0x795   : > { %v3714_v56 = vpop.f32.mrb[5].mxu1  ;;  %3724 = vmatmul.mubr.msk.f32.vlgmr.msra.gmra.mrb[0].mxu0 %vm1085_vm0, %v1368_v55 }
 0x796   : > { %3745 = vmatprep.mubr.msk.f32.mxu0 %vm4816_vm1, %v4817_v13  ;;  %3924 = vmatpush3.bf16.msra.mxu0 %v3923_v7 }
 0x797   : > { %3925 = vmatprep.subr.bf16.mxu0 %v4815_v10 }
 0x79a   : > { %3927 = vmatpush3.bf16.msra.mxu0 %v3926_v16 }
 0x79b   : > { %3928 = vmatprep.subr.bf16.mxu0 %v4815_v10 }
 0x79d   : > { %3746 = vmatmul.mubr.msk.f32.vlgmr.msra.gmra.mrb[2].mxu0 %vm1085_vm0, %v5600_v18 }
 0x79e   : > { %3766 = vmatprep.mubr.msk.f32.mxu0 %vm4816_vm1, %v4817_v13 }
 0x868   : > { %v1452_v58 = vpop.f32.mrb[0].mxu0 }
 0x869   : > { %v1453_v59 = vadd.f32 %v3525_v57, %v1452_v58  ;;  %v3725_v60 = vpop.f32.mrb[1].mxu0 }
 0x86a   : > { %v1834_v60 = vld [vmem:[#allocation16 + $0x8] sm:$0xff] }
 0x86b   : > { %v5578_v61 = vadd.f32 %v1453_v59, %v5499_v0  ;;  %v1493_v0 = vld [vmem:[%s6055_s24] sm:$0xff]  ;;  %v1833_v59 = vld [vmem:[#allocation16] sm:$0xff] }
 0x86c   : > { %v3917_v12 = vpack.c.bf16 %v1494_v8, %v1493_v0  ;;  %v3536_v8 = vld [vmem:[#allocation17] ss:$0 sm:$0xff] }
 0x86d   : > { %v1459_v62 = vsel %vm1085_vm0, %v5578_v61, 0.0 }
 0x86e   : > { %1460 = vadd.xlane.f32.xlu0 %v1459_v62  ;;  %3918 = vmatpush3.bf16.msra.mxu1 %v3917_v12  ;;  %v1835_v62 = vld [vmem:[#allocation16 + $0x10] sm:$0xff] }
 0x86f   : > { %3919 = vmatprep.subr.bf16.mxu1 %v4815_v10 }
 0x870   : > { %v1657_v35 = vpop.f32.mrb[2].mxu0 }
 0x871   : > { %v1658_v36 = vadd.f32 %v3531_v33, %v1657_v35  ;;  %v3747_v37 = vpop.f32.mrb[3].mxu0  ;;  %v2043_v33 = vld [vmem:[%s6057_s14 + $0x20] sm:$0xff]  ;;  %v2044_v35 = vld [vmem:[%s6057_s14 + $0x28] sm:$0xff] }
 0x872   : > { %3921 = vmatpush3.bf16.msra.mxu1 %v3920_v17 }
 0x873   : > { %3748 = vmatprep.subr.mxu1 %v4817_v13 }
 0x8fb   : > { %v1461_v63 = vpop.xlane.xlu0 %1460 }
 0x8fc   : > { %v1462_v1 = vmul.f32 0.03125, %v1461_v63  ;;  %v3929_v63 = vpack.c.bf16 %v1834_v60, %v1833_v59  ;;  %v3542_v60 = vld [vmem:[#allocation25] ss:$0 sm:$0xff] }
 0x8fe   : > { %v1463_v2 = vsub.f32 %v5578_v61, %v1462_v1  ;;  %v1836_v1 = vld [vmem:[#allocation16 + $0x18] sm:$0xff]  ;;  %3930 = vmatpush3.bf16.msra.mxu0 %v3929_v63 }
 0x8ff   : > { %3931 = vmatprep.subr.bf16.mxu0 %v4815_v10 }
 0x900   : > { %v1464_v3 = vmul.f32 %v1463_v2, %v1463_v2 }
 0x902   : > { %v1465_v4 = vsel %vm1085_vm0, %v1464_v3, 0.0 }
 0x903   : > { %1466 = vadd.xlane.f32.xlu1 %v1465_v4 }
 0x990   : > { %v1467_v19 = vpop.xlane.xlu1 %1466 }
 0x991   : > { %v1468_v20 = vmul.f32 0.032258064, %v1467_v19 }
 0x993   : > { %4205 = vrsqrt.f32 %v1468_v20  ;;  %vm1471_vm6 = vcmp.eq.f32.partialorder %v1468_v20, inf  ;;  %v1474_v23 = vand.u32 2147483648, %v1468_v20  ;;  %vm1473_vm7 = vcmp.eq.f32.partialorder %v1468_v20, 0.0 }
 0x99d   : > { %v4206_v21 = vpop.eup %4205 }
 0x99e   : > { %v1470_v22 = vmul.f32 %v4206_v21, %v1468_v20 }
 0x9a0   : > { %v1472_v24 = vsel %vm1471_vm6, %v1468_v20, %v1470_v22  ;;  %v1954_v22 = vld [vmem:[#allocation22] sm:$0xff] }
 0x9a1   : > { %v1475_v25 = vsel %vm1473_vm7, %v1474_v23, %v1472_v24  ;;  %v1955_v23 = vld [vmem:[#allocation22 + $0x8] sm:$0xff]  ;;  %v1956_v24 = vld [vmem:[#allocation22 + $0x10] sm:$0xff] }
 0x9a2   : > { %v1476_v26 = vadd.f32 1e-06, %v1475_v25  ;;  %v3935_v25 = vpack.c.bf16 %v1955_v23, %v1954_v22 }
 0x9a4   : > { %4207 = vrcp.f32 %v1476_v26  ;;  %v1957_v26 = vld [vmem:[#allocation22 + $0x18] sm:$0xff] }
 0x9ae   : > { %v4208_v27 = vpop.eup %4207 }
 0x9af   : > { %v1478_v29 = vmul.f32 %v4208_v27, %v1463_v2  ;;  %v3932_v2 = vpack.c.bf16 %v1836_v1, %v1835_v62  ;;  %v2039_v27 = vld [vmem:[%s6057_s14] sm:$0xff] }
 0x9b1   : > { %v1485_v31 = vmul.f32 %v3527_v28, %v1478_v29  ;;  %3933 = vmatpush3.bf16.msra.mxu0 %v3932_v2  ;;  %v2040_v28 = vld [vmem:[%s6057_s14 + $0x8] sm:$0xff]  ;;  %v2041_v29 = vld [vmem:[%s6057_s14 + $0x10] sm:$0xff] }
 0x9b2   : > { %3940 = vmatprep.subr.bf16.mxu0 %v4815_v10 }
 0x9b3   : > { %v1492_v32 = vadd.f32 %v3528_v30, %v1485_v31  ;;  %v3941_v30 = vpack.c.bf16 %v2040_v28, %v2039_v27  ;;  %v2042_v31 = vld [vmem:[%s6057_s14 + $0x18] sm:$0xff]  ;;  %v3547_v27 = vld [vmem:[%s6051_s9 + $0x1] ss:$0 sm:$0xff] }
 0x9b5   : > { %3735 = vmatmul.mubr.msk.f32.vlgmr.msra.gmra.mrb[6].mxu1 %vm1085_vm0, %v1492_v32  ;;  %v3944_v32 = vpack.c.bf16 %v2042_v31, %v2041_v29 }
 0x9b6   : > { %3750 = vmatprep.mubr.msk.f32.mxu1 %vm4816_vm1, %v4817_v13  ;;  %3749 = vmatpush3.xpose.msk.msra.mxu1 %vm1085_vm0, %v1658_v36 }
 0x9b7   : > { %3753 = vmatprep.subr.mxu1 %v4817_v13 }
 0xa88   : > { %v1573_v39 = vpop.f32.mrb[6].mxu1 }
 0xa89   : > { %v1574_v40 = vadd.f32 %v3529_v38, %v1573_v39  ;;  %v3736_v41 = vpop.f32.mrb[7].mxu1 }
 0xa8b   : > { %3751 = vmatmul.mubr.msk.f32.vlgmr.msra.gmra.mrb[8].mxu1 %vm1085_vm0, %v1574_v40 }
 0xa8c   : > { %3755 = vmatprep.mubr.msk.f32.mxu1 %vm4816_vm1, %v4817_v13 }
 0xb5e   : > { %v1733_v49 = vpop.f32.mrb[8].mxu1 }
 0xb5f   : > { %v1737_v50 = vmul.f32 0.17677669, %v1733_v49  ;;  %v3752_v51 = vpop.f32.mrb[9].mxu1  ;;  %v3539_v49 = vld [vmem:[#allocation20] ss:$0 sm:$0xff] }
 0xb61   : > { %v1745_v52 = vsel %vm1744_vm9, -1e+09, %v1737_v50 }
 0xb62   : > { %v1746_v53 = vsel %vm1284_vm5, %v1745_v52, -inf }
 0xb63   : > { %1747 = vmax.xlane.f32.xlu1 %v1746_v53  ;;  %v2046_v53 = vld [vmem:[%s6057_s14 + $0x38] sm:$0xff] }
 0xbf0   : > { %v1748_v54 = vpop.xlane.xlu1 %1747 }
 0xbf1   : > { %v1749_v55 = vsub.f32 %v1745_v52, %v1748_v54  ;;  %v2045_v52 = vld [vmem:[%s6057_s14 + $0x30] sm:$0xff] }
 0xbf2   : > { %v3950_v54 = vpack.c.bf16 %v2046_v53, %v2045_v52 }
 0xbf3   : > { %v1750_v56 = vmul.f32 1.442695, %v1749_v55  ;;  %v3540_v55 = vld [vmem:[#allocation23] ss:$0 sm:$0xff] }
 0xbf5   : > { %4209 = vpow2.f32 %v1750_v56 }
 0xbff   : > { %v4210_v57 = vpop.eup %4209 }
 0xc00   : > { %v1752_v58 = vsel %vm1284_vm5, %v4210_v57, 0.0 }
 0xc01   : > { %1753 = vadd.xlane.f32.xlu1 %v1752_v58 }
 0xc12   : > { %1757 = vrot.lane.b32.xlu1 %v1658_v36, %s4818_s23  ;;  %v3947_v36 = vpack.c.bf16 %v2044_v35, %v2043_v33 }
 0xc8e   : > { %v1754_v3 = vpop.xlane.xlu1 %1753 }
 0xc8f   : > { %4211 = vrcp.f32 %v1754_v3 }
 0xc92   : > { %v1758_v4 = vpop.permute.xlu1 %1757 }
 0xc93   : > { %3754 = vmatpush3.msra.mxu1 %v1758_v4 }
 0xc94   : > { %3934 = vmatprep.subr.bf16.mxu1 %v4815_v10 }
 0xc99   : > { %v4212_v5 = vpop.eup %4211 }
 0xc9a   : > { %v1756_v6 = vmul.f32 %v4212_v5, %v4210_v57 }
 0xc9c   : > { %3756 = vmatmul.mubr.msk.f32.vlgmr.msra.gmra.mrb[10].mxu1 %vm1284_vm5, %v1756_v6 }
 0xc9d   : > { %3777 = vmatprep.mubr.msk.f32.mxu1 %vm4816_vm1, %v4817_v13  ;;  %3936 = vmatpush3.bf16.msra.mxu1 %v3935_v25 }
 0xc9e   : > { %3937 = vmatprep.subr.bf16.mxu1 %v4815_v10 }
 0xd6f   : > { %v1829_v0 = vpop.f32.mrb[10].mxu1 }
 0xd70   : > { %v3757_v7 = vpop.f32.mrb[11].mxu1  ;;  %3767 = vmatmul.mubr.msk.f32.vlgmr.msra.gmra.mrb[4].mxu0 %vm1085_vm0, %v1829_v0 }
 0xd71   : > { %3796 = vmatprep.mubr.msk.f32.mxu0 %vm4816_vm1, %v4817_v13  ;;  %3942 = vmatpush3.bf16.msra.mxu0 %v3941_v30  ;;  %v3553_v30 = vld [vmem:[%s6052_s1 + $0x1] ss:$0 sm:$0xff] }
 0xd72   : > { %3943 = vmatprep.subr.bf16.mxu0 %v4815_v10 }
 0xd75   : > { %3945 = vmatpush3.bf16.msra.mxu0 %v3944_v32 }
 0xd76   : > { %3946 = vmatprep.subr.bf16.mxu0 %v4815_v10 }
 0xd79   : > { %3948 = vmatpush3.bf16.msra.mxu0 %v3947_v36 }
 0xd7a   : > { %3949 = vmatprep.subr.bf16.mxu0 %v4815_v10 }
 0xd7d   : > { %3951 = vmatpush3.bf16.msra.mxu0 %v3950_v54 }
 0xd7e   : > { %3958 = vmatprep.subr.bf16.mxu0 %v4815_v10 }
 0xe43   : > { %v1913_v9 = vpop.f32.mrb[4].mxu0 }
 0xe44   : > { %v1914_v11 = vadd.f32 %v3536_v8, %v1913_v9  ;;  %v3768_v12 = vpop.f32.mrb[5].mxu0  ;;  %v3548_v8 = vld [vmem:[%s6049_s11 + $0x20] sm:$0xff]  ;;  %v3549_v9 = vld [vmem:[%s6049_s11 + $0x28] sm:$0xff] }
 0xe45   : > { %v3953_v12 = vpack.c.bf16 %v3549_v9, %v3548_v8  ;;  %v2632_v8 = vld [vmem:[#allocation13 + $0x28] sm:$0xff] }
 0xe46   : > { %v5639_v14 = vadd.f32 %v1914_v11, %v5578_v61  ;;  %v3938_v61 = vpack.c.bf16 %v1957_v26, %v1956_v24  ;;  %v3550_v11 = vld [vmem:[%s6049_s11 + $0x30] sm:$0xff]  ;;  %v3546_v26 = vld [vmem:[%s6050_s19 + $0x1] ss:$0 sm:$0xff] }
 0xe47   : > { %v3567_v9 = vld [vmem:[%s6055_s24 + $0x20] sm:$0xff] }
 0xe48   : > { %v1920_v15 = vsel %vm1085_vm0, %v5639_v14, 0.0  ;;  %3939 = vmatpush3.bf16.msra.mxu1 %v3938_v61 }
 0xe49   : > { %1921 = vadd.xlane.f32.xlu0 %v1920_v15  ;;  %3952 = vmatprep.subr.bf16.mxu1 %v4815_v10 }
 0xed6   : > { %v1922_v16 = vpop.xlane.xlu0 %1921 }
 0xed7   : > { %v1923_v17 = vmul.f32 0.03125, %v1922_v16 }
 0xed9   : > { %v1924_v19 = vsub.f32 %v5639_v14, %v1923_v17 }
 0xedb   : > { %v1925_v20 = vmul.f32 %v1924_v19, %v1924_v19 }
 0xedd   : > { %v1926_v21 = vsel %vm1085_vm0, %v1925_v20, 0.0 }
 0xede   : > { %1927 = vadd.xlane.f32.xlu0 %v1926_v21 }
 0xf6b   : > { %v1928_v37 = vpop.xlane.xlu0 %1927 }
 0xf6c   : > { %v1929_v38 = vmul.f32 0.032258064, %v1928_v37 }
 0xf6e   : > { %4213 = vrsqrt.f32 %v1929_v38  ;;  %vm1932_vm10 = vcmp.eq.f32.partialorder %v1929_v38, inf  ;;  %v1935_v41 = vand.u32 2147483648, %v1929_v38  ;;  %vm1934_vm11 = vcmp.eq.f32.partialorder %v1929_v38, 0.0 }
 0xf78   : > { %v4214_v39 = vpop.eup %4213 }
 0xf79   : > { %v1931_v40 = vmul.f32 %v4214_v39, %v1929_v38 }
 0xf7b   : > { %v1933_v42 = vsel %vm1932_vm10, %v1929_v38, %v1931_v40 }
 0xf7c   : > { %v1936_v43 = vsel %vm1934_vm11, %v1935_v41, %v1933_v42 }
 0xf7d   : > { %v1937_v44 = vadd.f32 1e-06, %v1936_v43 }
 0xf7f   : > { %4215 = vrcp.f32 %v1937_v44 }
 0xf89   : > { %v4216_v45 = vpop.eup %4215 }
 0xf8a   : > { %v1939_v47 = vmul.f32 %v4216_v45, %v1924_v19 }
 0xf8c   : > { %v1946_v50 = vmul.f32 %v3538_v46, %v1939_v47  ;;  %v3558_v46 = vld [vmem:[%s6053_s12 + $0x20] sm:$0xff]  ;;  %v3560_v47 = vld [vmem:[%s6053_s12 + $0x30] sm:$0xff] }
 0xf8e   : > { %v1953_v51 = vadd.f32 %v3539_v49, %v1946_v50  ;;  %v3959_v49 = vpack.c.bf16 %v3559_v34, %v3558_v46  ;;  %v3561_v50 = vld [vmem:[%s6053_s12 + $0x38] sm:$0xff] }
 0xf90   : > { %3778 = vmatmul.mubr.msk.f32.vlgmr.msra.gmra.mrb[12].mxu1 %vm1085_vm0, %v1953_v51  ;;  %v3962_v51 = vpack.c.bf16 %v3561_v50, %v3560_v47 }
 0xf91   : > { %3807 = vmatprep.mubr.msk.f32.mxu1 %vm4816_vm1, %v4817_v13  ;;  %3954 = vmatpush3.bf16.msra.mxu1 %v3953_v12  ;;  %v2633_v12 = vld [vmem:[#allocation13 + $0x30] sm:$0xff] }
 0xf92   : > { %3955 = vmatprep.subr.bf16.mxu1 %v4815_v10 }
0x1063   : > { %v2034_v56 = vpop.f32.mrb[12].mxu1 }
0x1064   : > { %v2035_v57 = vadd.f32 %v3540_v55, %v2034_v56  ;;  %v3779_v58 = vpop.f32.mrb[13].mxu1 }
0x1065   : > { %v3563_v58 = vld [vmem:[%s6054_s17 + $0x1] ss:$0 sm:$0xff] }
0x1066   : > { %v2038_v59 = vmax.f32 %v2035_v57, 0.0 }
0x1068   : > { %3797 = vmatmul.mubr.msk.f32.vlgmr.msra.gmra.mrb[6].mxu0 %vm2054_vm12, %v2038_v59 }
0x1069   : > { %3828 = vmatprep.mubr.msk.f32.mxu0 %vm4816_vm1, %v4817_v13  ;;  %3960 = vmatpush3.bf16.msra.mxu0 %v3959_v49 }
0x106a   : > { %3961 = vmatprep.subr.bf16.mxu0 %v4815_v10 }
0x106d   : > { %3963 = vmatpush3.bf16.msra.mxu0 %v3962_v51 }
0x106e   : > { %3970 = vmatprep.subr.bf16.mxu0 %v4815_v10 }
0x113b   : > { %v2124_v62 = vpop.f32.mrb[6].mxu0 }
0x113c   : > { %v2125_v63 = vadd.f32 %v3542_v60, %v2124_v62  ;;  %v3798_v1 = vpop.f32.mrb[7].mxu0 }
0x113e   : > { %v5682_v2 = vadd.f32 %v2125_v63, %v5639_v14  ;;  %v3551_v14 = vld [vmem:[%s6049_s11 + $0x38] sm:$0xff] }
0x113f   : > { %v3956_v15 = vpack.c.bf16 %v3551_v14, %v3550_v11  ;;  %v3568_v11 = vld [vmem:[%s6055_s24 + $0x28] sm:$0xff] }
0x1140   : > { %v2133_v3 = vsel %vm1085_vm0, %v5682_v2, 0.0  ;;  %v2634_v14 = vld [vmem:[#allocation13 + $0x38] sm:$0xff] }
0x1141   : > { %2134 = vadd.xlane.f32.xlu1 %v2133_v3  ;;  %3957 = vmatpush3.bf16.msra.mxu1 %v3956_v15  ;;  %v3965_v15 = vpack.c.bf16 %v3568_v11, %v3567_v9 }
0x1142   : > { %3810 = vmatprep.subr.mxu1 %v4817_v13 }
0x11ce   : > { %v2135_v4 = vpop.xlane.xlu1 %2134 }
0x11cf   : > { %v2136_v5 = vmul.f32 0.03125, %v2135_v4 }
0x11d1   : > { %v2137_v6 = vsub.f32 %v5682_v2, %v2136_v5 }
0x11d3   : > { %v2138_v0 = vmul.f32 %v2137_v6, %v2137_v6 }
0x11d5   : > { %v2139_v7 = vsel %vm1085_vm0, %v2138_v0, 0.0 }
0x11d6   : > { %2140 = vadd.xlane.f32.xlu0 %v2139_v7  ;;  %v2631_v7 = vld [vmem:[#allocation13 + $0x20] sm:$0xff] }
0x1263   : > { %v2141_v16 = vpop.xlane.xlu0 %2140 }
0x1264   : > { %v2142_v17 = vmul.f32 0.032258064, %v2141_v16  ;;  %v3569_v16 = vld [vmem:[%s6055_s24 + $0x30] sm:$0xff] }
0x1266   : > { %4217 = vrsqrt.f32 %v2142_v17  ;;  %vm2145_vm13 = vcmp.eq.f32.partialorder %v2142_v17, inf  ;;  %v2148_v21 = vand.u32 2147483648, %v2142_v17  ;;  %vm2147_vm14 = vcmp.eq.f32.partialorder %v2142_v17, 0.0 }
0x1270   : > { %v4218_v19 = vpop.eup %4217 }
0x1271   : > { %v2144_v20 = vmul.f32 %v4218_v19, %v2142_v17  ;;  %v3974_v19 = vpack.c.bf16 %v2634_v14, %v2633_v12  ;;  %v3005_v14 = vld [vmem:[#allocation22 + $0x28] sm:$0xff] }
0x1273   : > { %v2146_v22 = vsel %vm2145_vm13, %v2142_v17, %v2144_v20  ;;  %v3570_v17 = vld [vmem:[%s6055_s24 + $0x38] sm:$0xff] }
0x1274   : > { %v2149_v23 = vsel %vm2147_vm14, %v2148_v21, %v2146_v22  ;;  %v3968_v20 = vpack.c.bf16 %v3570_v17, %v3569_v16  ;;  %v3007_v17 = vld [vmem:[#allocation22 + $0x38] sm:$0xff] }
0x1275   : > { %v2150_v24 = vadd.f32 1e-06, %v2149_v23 }
0x1277   : > { %4219 = vrcp.f32 %v2150_v24 }
0x1281   : > { %v4220_v25 = vpop.eup %4219 }
0x1282   : > { %v2152_v61 = vmul.f32 %v4220_v25, %v2137_v6 }
0x1284   : > { %v2159_v28 = vmul.f32 %v3546_v26, %v2152_v61 }
0x1286   : > { %v2166_v29 = vadd.f32 %v3547_v27, %v2159_v28 }
0x1288   : > { %3808 = vmatmul.mubr.msk.f32.vlgmr.msra.gmra.mrb[14].mxu1 %vm1085_vm0, %v2166_v29  ;;  %v3565_v29 = vld [vmem:[#allocation8 + $0x1] ss:$0 sm:$0xff] }
0x1289   : > { %3812 = vmatprep.mubr.msk.f32.mxu1 %vm4816_vm1, %v4817_v13 }
0x135b   : > { %v2249_v31 = vpop.f32.mrb[14].mxu1 }
0x135c   : > { %v2250_v32 = vadd.f32 %v3553_v30, %v2249_v31  ;;  %v3809_v33 = vpop.f32.mrb[15].mxu1  ;;  %v3566_v31 = vld [vmem:[#allocation10 + $0x1] ss:$0 sm:$0xff] }
0x135d   : > { %v3573_v33 = vld [vmem:[#allocation14 + $0x1] ss:$0 sm:$0xff] }
0x135e   : > { %2254 = vrot.lane.b32.xlu0 %v2250_v32, %s4818_s23 }
0x13d0   : > { %v2255_v35 = vpop.permute.xlu0 %2254 }
0x13d1   : > { %3811 = vmatpush3.xpose.msk.msra.mxu1 %vm1085_vm0, %v2255_v35 }
0x13d2   : > { %3815 = vmatprep.subr.mxu1 %v4817_v13 }
0x13d4   : > { %3813 = vmatmul.mubr.msk.f32.vlgmr.msra.gmra.mrb[16].mxu1 %vm1085_vm0, %v2250_v32 }
0x13d5   : > { %3817 = vmatprep.mubr.msk.f32.mxu1 %vm4816_vm1, %v4817_v13 }
0x14a7   : > { %v2326_v36 = vpop.f32.mrb[16].mxu1 }
0x14a8   : > { %v2330_v37 = vmul.f32 0.17677669, %v2326_v36  ;;  %v3814_v38 = vpop.f32.mrb[17].mxu1 }
0x14a9   : > { %v3571_v38 = vld [vmem:[#allocation11 + $0x1] ss:$0 sm:$0xff] }
0x14aa   : > { %v2331_v39 = vsel %vm1282_vm4, -1e+09, %v2330_v37 }
0x14ab   : > { %v2332_v40 = vsel %vm1284_vm5, %v2331_v39, -inf }
0x14ac   : > { %2333 = vmax.xlane.f32.xlu0 %v2332_v40 }
0x1539   : > { %v2334_v41 = vpop.xlane.xlu0 %2333 }
0x153a   : > { %v2335_v42 = vsub.f32 %v2331_v39, %v2334_v41 }
0x153c   : > { %v2336_v43 = vmul.f32 1.442695, %v2335_v42 }
0x153e   : > { %4221 = vpow2.f32 %v2336_v43 }
0x1548   : > { %v4222_v44 = vpop.eup %4221 }
0x1549   : > { %v2338_v45 = vsel %vm1284_vm5, %v4222_v44, 0.0 }
0x154a   : > { %2339 = vadd.xlane.f32.xlu1 %v2338_v45 }
0x155b   : > { %2343 = vrot.lane.b32.xlu1 %v2250_v32, %s4819_s27  ;;  %s3219_s27 = scalar_lea.sflag [#allocation4], %s5453_s10 }
0x15d7   : > { %v2340_v52 = vpop.xlane.xlu1 %2339 }
0x15d8   : > { %4223 = vrcp.f32 %v2340_v52  ;;  %v2879_v52 = vld [vmem:[#allocation16 + $0x20] sm:$0xff] }
0x15db   : > { %v2344_v53 = vpop.permute.xlu1 %2343 }
0x15dc   : > { %3816 = vmatpush3.msra.mxu1 %v2344_v53  ;;  %v2880_v53 = vld [vmem:[#allocation16 + $0x28] sm:$0xff] }
0x15dd   : > { %3964 = vmatprep.subr.bf16.mxu1 %v4815_v10 }
0x15e2   : > { %v4224_v54 = vpop.eup %4223 }
0x15e3   : > { %v2342_v55 = vmul.f32 %v4224_v54, %v4222_v44  ;;  %v2881_v54 = vld [vmem:[#allocation16 + $0x30] sm:$0xff] }
0x15e5   : > { %3818 = vmatmul.mubr.msk.f32.vlgmr.msra.gmra.mrb[18].mxu1 %vm1284_vm5, %v2342_v55  ;;  %v3977_v55 = vpack.c.bf16 %v2880_v53, %v2879_v52 }
0x15e6   : > { %3839 = vmatprep.mubr.msk.f32.mxu1 %vm4816_vm1, %v4817_v13  ;;  %3966 = vmatpush3.bf16.msra.mxu1 %v3965_v15  ;;  %v3006_v15 = vld [vmem:[#allocation22 + $0x30] sm:$0xff] }
0x15e7   : > { %3967 = vmatprep.subr.bf16.mxu1 %v4815_v10 }
0x15ea   : > { %3969 = vmatpush3.bf16.msra.mxu1 %v3968_v20  ;;  %v3585_v20 = vld [vmem:[%s6057_s14 + $0x48] sm:$0xff] }
0x15eb   : > { %3853 = vmatprep.subr.mxu1 %v4817_v13 }
0x16b8   : > { %v2415_v56 = vpop.f32.mrb[18].mxu1 }
0x16b9   : > { %v3819_v57 = vpop.f32.mrb[19].mxu1  ;;  %3829 = vmatmul.mubr.msk.f32.vlgmr.msra.gmra.mrb[8].mxu0 %vm1085_vm0, %v2415_v56  ;;  %v2882_v56 = vld [vmem:[#allocation16 + $0x38] sm:$0xff] }
0x16ba   : > { %3850 = vmatprep.mubr.msk.f32.mxu0 %vm4816_vm1, %v4817_v13  ;;  %v3980_v48 = vpack.c.bf16 %v2882_v56, %v2881_v54 }
0x178c   : > { %v2501_v59 = vpop.f32.mrb[8].mxu0 }
0x178d   : > { %v2502_v60 = vadd.f32 %v3563_v58, %v2501_v59  ;;  %v3830_v62 = vpop.f32.mrb[9].mxu0 }
0x178f   : > { %v5750_v63 = vadd.f32 %v2502_v60, %v5682_v2  ;;  %v3971_v2 = vpack.c.bf16 %v2632_v8, %v2631_v7 }
0x1791   : > { %v2510_v1 = vsel %vm1085_vm0, %v5750_v63, 0.0  ;;  %3972 = vmatpush3.bf16.msra.mxu0 %v3971_v2 }
0x1792   : > { %2511 = vadd.xlane.f32.xlu1 %v2510_v1  ;;  %3973 = vmatprep.subr.bf16.mxu0 %v4815_v10 }
0x1795   : > { %3975 = vmatpush3.bf16.msra.mxu0 %v3974_v19  ;;  %v3584_v19 = vld [vmem:[%s6057_s14 + $0x40] sm:$0xff] }
0x1796   : > { %3976 = vmatprep.subr.bf16.mxu0 %v4815_v10 }
0x1798   : > { %3851 = vmatmul.mubr.msk.f32.vlgmr.msra.gmra.mrb[10].mxu0 %vm1085_vm0, %v5600_v18 }
0x1799   : > { %3871 = vmatprep.mubr.msk.f32.mxu0 %vm4816_vm1, %v4817_v13  ;;  %3978 = vmatpush3.bf16.msra.mxu0 %v3977_v55 }
0x179a   : > { %3979 = vmatprep.subr.bf16.mxu0 %v4815_v10 }
0x179d   : > { %3981 = vmatpush3.bf16.msra.mxu0 %v3980_v48 }
0x179e   : > { %3988 = vmatprep.subr.bf16.mxu0 %v4815_v10 }
0x181f   : > { %v2512_v3 = vpop.xlane.xlu1 %2511 }
0x1820   : > { %v2513_v4 = vmul.f32 0.03125, %v2512_v3  ;;  %v3578_v3 = vld [vmem:[#allocation17 + $0x1] ss:$0 sm:$0xff] }
0x1822   : > { %v2514_v5 = vsub.f32 %v5750_v63, %v2513_v4 }
0x1824   : > { %v2515_v6 = vmul.f32 %v2514_v5, %v2514_v5 }
0x1826   : > { %v2516_v0 = vsel %vm1085_vm0, %v2515_v6, 0.0 }
0x1827   : > { %2517 = vadd.xlane.f32.xlu0 %v2516_v0 }
0x186b   : > { %v2709_v35 = vpop.f32.mrb[10].mxu0 }
0x186c   : > { %v2710_v36 = vadd.f32 %v3573_v33, %v2709_v35  ;;  %v3852_v37 = vpop.f32.mrb[11].mxu0 }
0x18b4   : > { %v2518_v21 = vpop.xlane.xlu0 %2517 }
0x18b5   : > { %v2519_v22 = vmul.f32 0.032258064, %v2518_v21  ;;  %v3586_v21 = vld [vmem:[%s6057_s14 + $0x50] sm:$0xff] }
0x18b7   : > { %4225 = vrsqrt.f32 %v2519_v22  ;;  %vm2522_vm15 = vcmp.eq.f32.partialorder %v2519_v22, inf  ;;  %v2525_v25 = vand.u32 2147483648, %v2519_v22  ;;  %vm2524_vm2 = vcmp.eq.f32.partialorder %v2519_v22, 0.0 }
0x18c1   : > { %v4226_v23 = vpop.eup %4225 }
0x18c2   : > { %v2521_v24 = vmul.f32 %v4226_v23, %v2519_v22  ;;  %v3587_v23 = vld [vmem:[%s6057_s14 + $0x58] sm:$0xff] }
0x18c4   : > { %v2523_v26 = vsel %vm2522_vm15, %v2519_v22, %v2521_v24  ;;  %v3989_v22 = vpack.c.bf16 %v3585_v20, %v3584_v19  ;;  %v3992_v24 = vpack.c.bf16 %v3587_v23, %v3586_v21 }
0x18c5   : > { %v2526_v61 = vsel %vm2524_vm2, %v2525_v25, %v2523_v26  ;;  %v3588_v25 = vld [vmem:[%s6057_s14 + $0x60] sm:$0xff]  ;;  %v3589_v26 = vld [vmem:[%s6057_s14 + $0x68] sm:$0xff] }
0x18c6   : > { %v2527_v27 = vadd.f32 1e-06, %v2526_v61  ;;  %v3995_v61 = vpack.c.bf16 %v3589_v26, %v3588_v25 }
0x18c8   : > { %4227 = vrcp.f32 %v2527_v27 }
0x18d2   : > { %v4228_v28 = vpop.eup %4227 }
0x18d3   : > { %v2529_v30 = vmul.f32 %v4228_v28, %v2514_v5 }
0x18d5   : > { %v2536_v18 = vmul.f32 %v3565_v29, %v2529_v30 }
0x18d7   : > { %v2543_v32 = vadd.f32 %v3566_v31, %v2536_v18 }
0x18d9   : > { %3840 = vmatmul.mubr.msk.f32.vlgmr.msra.gmra.mrb[20].mxu1 %vm1085_vm0, %v2543_v32 }
0x18da   : > { %3855 = vmatprep.mubr.msk.f32.mxu1 %vm4816_vm1, %v4817_v13  ;;  %3854 = vmatpush3.xpose.msk.msra.mxu1 %vm1085_vm0, %v2710_v36 }
0x18db   : > { %3858 = vmatprep.subr.mxu1 %v4817_v13 }
0x19ac   : > { %v2626_v39 = vpop.f32.mrb[20].mxu1 }
0x19ad   : > { %v2627_v40 = vadd.f32 %v3571_v38, %v2626_v39  ;;  %v3841_v41 = vpop.f32.mrb[21].mxu1  ;;  %v3581_v38 = vld [vmem:[#allocation20 + $0x1] ss:$0 sm:$0xff] }
0x19ae   : > { %v3591_v41 = vld [vmem:[%s6057_s14 + $0x78] sm:$0xff] }
0x19af   : > { %3856 = vmatmul.mubr.msk.f32.vlgmr.msra.gmra.mrb[22].mxu1 %vm1085_vm0, %v2627_v40 }
0x19b0   : > { %3860 = vmatprep.mubr.msk.f32.mxu1 %vm4816_vm1, %v4817_v13 }
0x1a82   : > { %v2785_v42 = vpop.f32.mrb[22].mxu1 }
0x1a83   : > { %v2789_v43 = vmul.f32 0.17677669, %v2785_v42  ;;  %v3857_v44 = vpop.f32.mrb[23].mxu1 }
0x1a85   : > { %v2790_v45 = vsel %vm1744_vm9, -1e+09, %v2789_v43  ;;  %v3582_v43 = vld [vmem:[#allocation23 + $0x1] ss:$0 sm:$0xff] }
0x1a86   : > { %v2791_v46 = vsel %vm1284_vm5, %v2790_v45, -inf }
0x1a87   : > { %2792 = vmax.xlane.f32.xlu0 %v2791_v46 }
0x1b14   : > { %v2793_v34 = vpop.xlane.xlu0 %2792 }
0x1b15   : > { %v2794_v47 = vsub.f32 %v2790_v45, %v2793_v34 }
0x1b17   : > { %v2795_v49 = vmul.f32 1.442695, %v2794_v47  ;;  %v3592_v47 = vld [vmem:[#allocation25 + $0x1] ss:$0 sm:$0xff] }
0x1b19   : > { %4229 = vpow2.f32 %v2795_v49 }
0x1b23   : > { %v4230_v50 = vpop.eup %4229 }
0x1b24   : > { %v2797_v51 = vsel %vm1284_vm5, %v4230_v50, 0.0 }
0x1b25   : > { %2798 = vadd.xlane.f32.xlu0 %v2797_v51 }
0x1b3b   : > { %2802 = vrot.lane.b32.xlu0 %v2710_v36, %s4818_s23  ;;  %v3580_v36 = vld [vmem:[#allocation19 + $0x1] ss:$0 sm:$0xff]  ;;  %s6059_s23 = sld [smem:[#allocation70_spill]] }
0x1b41   : > { %s5846_s16 = scalar_lea.hbm %s6059_s23, %s3597_s30 }
0x1bb2   : > { %v2799_v57 = vpop.xlane.xlu0 %2798 }
0x1bb3   : > { %4231 = vrcp.f32 %v2799_v57 }
0x1bb6   : > { %v2803_v58 = vpop.permute.xlu0 %2802 }
0x1bb7   : > { %3859 = vmatpush3.msra.mxu1 %v2803_v58 }
0x1bb8   : > { %3982 = vmatprep.subr.bf16.mxu1 %v4815_v10 }
0x1bbd   : > { %v4232_v59 = vpop.eup %4231 }
0x1bbe   : > { %v2801_v60 = vmul.f32 %v4232_v59, %v4230_v50 }
0x1bc0   : > { %3861 = vmatmul.mubr.msk.f32.vlgmr.msra.gmra.mrb[24].mxu1 %vm1284_vm5, %v2801_v60 }
0x1bc1   : > { %3882 = vmatprep.mubr.msk.f32.mxu1 %vm4816_vm1, %v4817_v13 }
0x1c93   : > { %v2874_v62 = vpop.f32.mrb[24].mxu1 }
0x1c94   : > { %v3862_v1 = vpop.f32.mrb[25].mxu1  ;;  %3872 = vmatmul.mubr.msk.f32.vlgmr.msra.gmra.mrb[12].mxu0 %vm1085_vm0, %v2874_v62 }
0x1c95   : > { %3901 = vmatprep.mubr.msk.f32.mxu0 %vm4816_vm1, %v4817_v13  ;;  %v3004_v13 = vld [vmem:[#allocation22 + $0x20] sm:$0xff]  ;;  %3990 = vmatpush3.bf16.msra.mxu0 %v3989_v22 }
0x1c96   : > { %v3983_v16 = vpack.c.bf16 %v3005_v14, %v3004_v13  ;;  %3991 = vmatprep.subr.bf16.mxu0 %v4815_v10 }
0x1c98   : > { %3984 = vmatpush3.bf16.msra.mxu1 %v3983_v16 }
0x1c99   : > { %3985 = vmatprep.subr.bf16.mxu1 %v4815_v10  ;;  %3993 = vmatpush3.bf16.msra.mxu0 %v3992_v24 }
0x1c9a   : > { %3994 = vmatprep.subr.bf16.mxu0 %v4815_v10 }
0x1c9d   : > { %3996 = vmatpush3.bf16.msra.mxu0 %v3995_v61 }
0x1c9e   : > { %3997 = vmatprep.subr.bf16.mxu0 %v4815_v10  ;;  %v3590_v10 = vld [vmem:[%s6057_s14 + $0x70] sm:$0xff] }
0x1c9f   : > { %v3998_v42 = vpack.c.bf16 %v3591_v41, %v3590_v10 }
0x1ca1   : > { %3999 = vmatpush3.bf16.msra.mxu0 %v3998_v42 }
0x1d67   : > { %v2960_v4 = vpop.f32.mrb[12].mxu0 }
0x1d68   : > { %v2961_v5 = vadd.f32 %v3578_v3, %v2960_v4  ;;  %v3873_v6 = vpop.f32.mrb[13].mxu0 }
0x1d6a   : > { %v5799_v0 = vadd.f32 %v2961_v5, %v5750_v63  ;;  %v3986_v63 = vpack.c.bf16 %v3007_v17, %v3006_v15 }
0x1d6c   : > { %v2969_v7 = vsel %vm1085_vm0, %v5799_v0, 0.0  ;;  %3987 = vmatpush3.bf16.msra.mxu1 %v3986_v63 }
0x1d6d   : > { %2970 = vadd.xlane.f32.xlu1 %v2969_v7 }
0x1dfa   : > { %v2971_v8 = vpop.xlane.xlu1 %2970 }
0x1dfb   : > { %v2972_v9 = vmul.f32 0.03125, %v2971_v8  ;;  %v3595_v8 = vld [vmem:[#allocation26] ss:$0 sm:$0xff] }
0x1dfd   : > { %v2973_v2 = vsub.f32 %v5799_v0, %v2972_v9 }
0x1dff   : > { %v2974_v11 = vmul.f32 %v2973_v2, %v2973_v2 }
0x1e01   : > { %v2975_v12 = vsel %vm1085_vm0, %v2974_v11, 0.0 }
0x1e02   : > { %2976 = vadd.xlane.f32.xlu0 %v2975_v12 }
0x1e8f   : > { %v2977_v27 = vpop.xlane.xlu0 %2976 }
0x1e90   : > { %v2978_v28 = vmul.f32 0.032258064, %v2977_v27 }
0x1e92   : > { %4233 = vrsqrt.f32 %v2978_v28  ;;  %vm2981_vm1 = vcmp.eq.f32.partialorder %v2978_v28, inf  ;;  %v2984_v31 = vand.u32 2147483648, %v2978_v28  ;;  %vm2983_vm3 = vcmp.eq.f32.partialorder %v2978_v28, 0.0 }
0x1e9c   : > { %v4234_v29 = vpop.eup %4233 }
0x1e9d   : > { %v2980_v30 = vmul.f32 %v4234_v29, %v2978_v28 }
0x1e9f   : > { %v2982_v18 = vsel %vm2981_vm1, %v2978_v28, %v2980_v30 }
0x1ea0   : > { %v2985_v32 = vsel %vm2983_vm3, %v2984_v31, %v2982_v18 }
0x1ea1   : > { %v2986_v33 = vadd.f32 1e-06, %v2985_v32 }
0x1ea3   : > { %4235 = vrcp.f32 %v2986_v33 }
0x1ead   : > { %v4236_v35 = vpop.eup %4235 }
0x1eae   : > { %v2988_v37 = vmul.f32 %v4236_v35, %v2973_v2 }
0x1eb0   : > { %v2995_v39 = vmul.f32 %v3580_v36, %v2988_v37 }
0x1eb2   : > { %v3002_v40 = vadd.f32 %v3581_v38, %v2995_v39 }
0x1eb4   : > { %3883 = vmatmul.mubr.msk.f32.vlgmr.msra.gmra.mrb[26].mxu1 %vm1085_vm0, %v3002_v40 }
0x1f87   : > { %v3085_v44 = vpop.f32.mrb[26].mxu1 }
0x1f88   : > { %v3086_v45 = vadd.f32 %v3582_v43, %v3085_v44  ;;  %v3884_v46 = vpop.f32.mrb[27].mxu1 }
0x1f8a   : > { %v3089_v34 = vmax.f32 %v3086_v45, 0.0 }
0x1f8c   : > { %3902 = vmatmul.mubr.msk.f32.vlgmr.msra.gmra.mrb[14].mxu0 %vm2054_vm12, %v3089_v34 }
0x205f   : > { %v3176_v49 = vpop.f32.mrb[14].mxu0 }
0x2060   : > { %v3177_v50 = vadd.f32 %v3592_v47, %v3176_v49  ;;  %v3903_v51 = vpop.f32.mrb[15].mxu0 }
0x2062   : > { %v3180_v52 = vadd.f32 %v3177_v50, %v5799_v0  ;;  %v3594_v0 = vld [vmem:[%s6058_s0] ss:$0 sm:$0xff] }
0x2064   : > { %v3183_v53 = vsel %vm1085_vm0, %v3180_v52, 0.0 }
0x2065   : > { %3184 = vadd.xlane.f32.xlu1 %v3183_v53 }
0x20f2   : > { %v3185_v54 = vpop.xlane.xlu1 %3184 }
0x20f3   : > { %v3186_v55 = vmul.f32 0.03125, %v3185_v54 }
0x20f5   : > { %v3187_v56 = vsub.f32 %v3180_v52, %v3186_v55 }
0x20f7   : > { %v3188_v48 = vmul.f32 %v3187_v56, %v3187_v56 }
0x20f9   : > { %v3189_v57 = vsel %vm1085_vm0, %v3188_v48, 0.0 }
0x20fa   : > { %3190 = vadd.xlane.f32.xlu1 %v3189_v57 }
0x2187   : > { %v3191_v58 = vpop.xlane.xlu1 %3190 }
0x2188   : > { %v3192_v59 = vmul.f32 0.032258064, %v3191_v58 }
0x218a   : > { %4237 = vrsqrt.f32 %v3192_v59  ;;  %vm3195_vm4 = vcmp.eq.f32.partialorder %v3192_v59, inf  ;;  %v3198_v1 = vand.u32 2147483648, %v3192_v59  ;;  %vm3197_vm5 = vcmp.eq.f32.partialorder %v3192_v59, 0.0 }
0x2194   : > { %v4238_v60 = vpop.eup %4237 }
0x2195   : > { %v3194_v62 = vmul.f32 %v4238_v60, %v3192_v59 }
0x2197   : > { %v3196_v3 = vsel %vm3195_vm4, %v3192_v59, %v3194_v62 }
0x2198   : > { %v3199_v4 = vsel %vm3197_vm5, %v3198_v1, %v3196_v3 }
0x2199   : > { %v3200_v5 = vadd.f32 1e-06, %v3199_v4 }
0x219b   : > { %4239 = vrcp.f32 %v3200_v5 }
0x21a5   : > { %v4240_v6 = vpop.eup %4239 }
0x21a6   : > { %v3202_v7 = vmul.f32 %v4240_v6, %v3187_v56 }
0x21a8   : > { %v3209_v9 = vmul.f32 %v3594_v0, %v3202_v7 }
0x21aa   : > { %v3216_v2 = vadd.f32 %v3595_v8, %v3209_v9 }
0x21ac   : > { %3217 = vst.msk [vmem:[%s1075_s15] sm:$0xff] %vm1085_vm0, %v3216_v2 }
0x21ad   : > { %4708 = shalt.err (!%p4705_p7)
}
0x21ae   : > { %s4709_s10 = scalar_lea.hbm %s5846_s16, 128  ;;  %s4713_s30 = scalar_lea.hbm %s6059_s23, 256 }
0x21af   : > { %p4710_p12 = scmp.ne.s32.totalorder %s5846_s16, %s4709_s10  ;;  %p4714_p2 = scmp.lt.u32.totalorder %s5846_s16, %s6059_s23 }
0x21b0   : > { %p4715_p13 = scmp.lt.u32.totalorder %s4713_s30, %s4709_s10  ;;  %p4717_p3 = scmp.lt.u32.totalorder %s4709_s10, %s5846_s16 }
0x21b1   : > { %p4711_p4 = pnand %p4710_p12, %p6060_p0 }
0x21b2   : > { %p4716_p8 = por %p4715_p13, %p4714_p2 }
0x21b3   : > { %p4712_p10 = pneg %p4711_p4 }
0x21b4   : > { %p4718_p5 = por %p4717_p3, %p4716_p8 }
0x21b6   : > { %p4719_p9 = pnand %p4718_p5, %p4712_p10 }
0x21b8   : > { %4722 = shalt.err (!%p4719_p9)
}
0x21b9   : > { %4058 = dma.vmem_to_hbm [thread:$0]  (%p6060_p0), %s5848_s8, 128, %s5846_s16, %s3219_s27  }
0x21ba PF: > { %s6061_s13 = sld [smem:[#allocation39_spill]]  ;;  %s6062_s4 = sld [smem:[#allocation44_spill]] }
0x21bb   : > { %s6063_s29 = sld [smem:[#allocation40_spill]] }
0x21c0   : > { %s3244_s26 = sand.u32 1, %s6061_s13   ;;  %p6064_p6 = scmp.ne.s32.totalorder %s6062_s4, 0 }
0x21c1   : > { %p6065_p1 = scmp.ge.s32.totalorder %s6063_s29, 2  ;;  %s3245_s28 = scalar_lea.sflag [#allocation4], %s3244_s26 }
0x21c3   : > { %p4111_p11 = pnand %p6065_p1, %p6064_p6 }
0x21c5   : > { %4776 = dma.done.wait (!%p4111_p11), %s3245_s28, 128  }
0x21c6   : > { %4778 = vsyncadd (!%p4111_p11), %s3245_s28, 4294967168  ;;  %s6066_s28 = sld [smem:[#allocation42_spill]]  ;;  %s6067_s10 = sld [smem:[#allocation43_spill]] }
0x21c7   : > { %s6068_s27 = smov %s4785_s3  ;;  %s6069_s3 = smov %s4789_s7 }
0x21cc   : > { %p49_p7 = scmp.ge.s32.totalorder %s6066_s28, 4   ;;  %s6070_s7 = smov %s6067_s10 }
0x21ce   :  { %51 = sbr.rel (!%p49_p7) target bundleno = 41 (0x29), region = 268 }
0x21d5   :  { %3250 = vsyncpa [#allocation3], 1 }
0x21d6   :  { %3252 = vsyncpa [#allocation3 + $0x1], 1 }
0x21d7   :  { %3253 = vsyncpa [#allocation6], 1 }
0x21d8   :  { %3255 = vsyncpa [#allocation6 + $0x1], 1 }
0x21d9   :  { %3256 = vsyncpa [#allocation9], 1 }
0x21da   :  { %3257 = vsyncpa [#allocation12], 1 }
0x21db   :  { %3258 = vsyncpa [#allocation15], 1 }
0x21dc   :  { %3259 = vsyncpa [#allocation18], 1 }
0x21dd   :  { %3260 = vsyncpa [#allocation21], 1 }
0x21de   :  { %3261 = vsyncpa [#allocation24], 1 }
0x21df   :  { %3262 = vsyncpa [#allocation27], 1 }
0x21e0   :  { %3263 = vsyncpa [#allocation4], 1 }
0x21e1   :  { %3265 = vsyncpa [#allocation4 + $0x1], 1 }

</bundles_post_ra>
